<compile_context>
chip_gen: v7x
topology: tpu7x:2x2x1
jax: 0.10.0
libtpu: 0.0.40
codegen_flags: <defaults>
</compile_context>

<pallas_src>
import functools

import jax
import jax.numpy as jnp
from jax.experimental import pallas as pl
from jax.experimental.pallas import tpu as pltpu


# --------------------------------------------------------------------------------------
# Kernels
# --------------------------------------------------------------------------------------
def _window_taps(xm_ref, xh_ref):
    """Nine shifted (TR*W, Cin) window slices of the 1-padded original-resolution input."""
    tr, wp, cin = xm_ref.shape[1], xm_ref.shape[2], xm_ref.shape[3]
    w = wp - 2
    # rows [r*TR, r*TR + TR + 2) of the padded image: main block + first 2 halo rows
    full = jnp.concatenate([xm_ref[0], xh_ref[0, :2]], axis=0)        # (TR+2, W+2, Cin)
    taps = []
    for u in range(3):
        for v in range(3):
            taps.append(full[u:u + tr, v:v + w, :].reshape(tr * w, cin))
    return taps


def _upsample_conv_kernel_folded(xm_ref, xh_ref, w_ref, b_ref, o_ref):
    # xm_ref: (1, TR, W+2, Cin)      main row slab of padded input
    # xh_ref: (1, HALO, W+2, Cin)    next slab; first 2 rows are the halo
    # w_ref : (9*Cin, 4*Cout_pad)    folded 4-phase weights
    # b_ref : (1, 4*Cout_pad)        bias (f32)
    # o_ref : (1, TR*W, 4*Cout_pad)  4 phases per original pixel, lane-dense
    taps = _window_taps(xm_ref, xh_ref)
    patches = jnp.concatenate(taps, axis=-1)                          # (TR*W, 9*Cin)
    acc = jnp.dot(patches, w_ref[...], preferred_element_type=jnp.float32)
    acc = acc + b_ref[...].astype(jnp.float32)
    o_ref[0] = acc.astype(o_ref.dtype)


def _upsample_conv_kernel_pertap(xm_ref, xh_ref, w_ref, b_ref, o_ref):
    # Fallback: identical math, contraction split into 9 accumulated MXU calls.
    taps = _window_taps(xm_ref, xh_ref)
    cin = xm_ref.shape[3]
    wm = w_ref[...]
    acc = jnp.zeros((o_ref.shape[1], o_ref.shape[2]), jnp.float32)
    for t, tap in enumerate(taps):
        acc = acc + jnp.dot(tap, wm[t * cin:(t + 1) * cin, :],
                            preferred_element_type=jnp.float32)
    acc = acc + b_ref[...].astype(jnp.float32)
    o_ref[0] = acc.astype(o_ref.dtype)


# --------------------------------------------------------------------------------------
# Wrapper helpers
# --------------------------------------------------------------------------------------
def _fold_weights(weight, bias, cout_pad):
    """Fold OIHW 3x3 conv weights into the 4-phase (9*Cin, 4*cout_pad) matrix + bias row."""
    cout, cin = int(weight.shape[0]), int(weight.shape[1])
    w_t = jnp.transpose(weight, (2, 3, 1, 0)).astype(jnp.float32)     # (3, 3, Cin, Cout)
    # conv tap index (kh or kw) -> 3x3 window offset (u or v), per phase 0 / phase 1
    off = ((0, 1, 1), (1, 1, 2))
    wmat = jnp.zeros((9, cin, 4, cout_pad), jnp.float32)
    for py in range(2):
        for px in range(2):
            ph = 2 * py + px
            for kh in range(3):
                for kw in range(3):
                    tap = 3 * off[py][kh] + off[px][kw]
                    wmat = wmat.at[tap, :, ph, :cout].add(w_t[kh, kw])
    wmat = wmat.reshape(9 * cin, 4 * cout_pad)
    bvec = jnp.zeros((4, cout_pad), jnp.float32).at[:, :cout].set(
        bias.astype(jnp.float32)[None, :]).reshape(1, 4 * cout_pad)
    return wmat, bvec


def _pick_row_tile(h, w, target_px=1024):
    """Row tile: multiple of 8 dividing H, ~1024 output pixels per tile, >=2 tiles if possible."""
    cands = [t for t in range(8, h + 1, 8) if h % t == 0 and 2 * t <= h]
    if not cands:
        cands = [t for t in range(8, h + 1, 8) if h % t == 0]
    if not cands:
        return h
    return min(cands, key=lambda t: abs(t * w - target_px))


def _vmem_limit_bytes():
    try:
        cap = int(pltpu.get_tpu_info().vmem_capacity_bytes)
    except Exception:
        cap = 64 * 1024 * 1024
    # ~96 MiB on 128-MiB chips (v5e/v6e), ~48 MiB on v7x's 64 MiB.
    return min(cap * 3 // 4, 96 * 1024 * 1024)


# --------------------------------------------------------------------------------------
# Forward
# --------------------------------------------------------------------------------------
@functools.partial(jax.jit, static_argnames=("fold_taps", "compute_dtype"))
def upsample_forward(x, weight, bias, *, fold_taps=True, compute_dtype=None):
    """x: (B, Cin, H, W) NCHW; weight: (Cout, Cin, 3, 3) OIHW; bias: (Cout,) -> (B, Cout, 2H, 2W).

    compute_dtype=jnp.bfloat16 halves activation/weight HBM traffic on v6e/v7x
    (accumulation stays f32); default keeps the input dtype.
    """
    B, Cin, H, W = x.shape
    Cout = weight.shape[0]
    assert H >= 2, "spatial height must be >= 2"
    out_dtype = x.dtype
    cdt = jnp.dtype(compute_dtype) if compute_dtype is not None else x.dtype

    cout_pad = max(32, -(-Cout // 32) * 32)      # 4*cout_pad is a multiple of 128 (lane-dense out)
    cq = 4 * cout_pad

    tr = _pick_row_tile(H, W)
    halo = 8 if tr % 8 == 0 else tr
    tr_over_halo = tr // halo
    nb = H // tr
    wp = W + 2

    # padded NHWC input: 1 row/col conv zero-padding; extra bottom zeros keep the
    # last row-block's halo BlockSpec in bounds.
    x_nhwc = jnp.transpose(x, (0, 2, 3, 1)).astype(cdt)                    # (B, H, W, Cin)
    xp = jnp.pad(x_nhwc, ((0, 0), (1, halo - 1), (1, 1), (0, 0)))          # (B, H+halo, W+2, Cin)

    wmat, bvec = _fold_weights(weight, bias, cout_pad)
    wmat = wmat.astype(cdt)

    kernel = _upsample_conv_kernel_folded if fold_taps else _upsample_conv_kernel_pertap

    out_flat = pl.pallas_call(
        kernel,
        out_shape=jax.ShapeDtypeStruct((B, H * W, cq), out_dtype),
        grid=(B, nb),
        in_specs=[
            # main TR-row slab of the padded input
            pl.BlockSpec((1, tr, wp, Cin), lambda b, r: (b, r, 0, 0)),
            # halo: start of the next slab (only its first 2 rows are used)
            pl.BlockSpec((1, halo, wp, Cin),
                         lambda b, r: (b, (r + 1) * tr_over_halo, 0, 0)),
            # folded weights / bias: constant index map -> resident across the grid
            pl.BlockSpec((9 * Cin, cq), lambda b, r: (0, 0)),
            pl.BlockSpec((1, cq), lambda b, r: (0, 0)),
        ],
        out_specs=pl.BlockSpec((1, tr * W, cq), lambda b, r: (b, r, 0)),
        compiler_params=pltpu.CompilerParams(
            dimension_semantics=("parallel", "parallel"),
            vmem_limit_bytes=_vmem_limit_bytes(),
        ),
    )(xp, xp, wmat, bvec)

    # (B, H*W, 4*cout_pad) -> NCHW (B, Cout, 2H, 2W); phase index = 2*py + px.
    out = out_flat.reshape(B, H, W, 2, 2, cout_pad)[..., :Cout]
    out = jnp.transpose(out, (0, 5, 1, 3, 2, 4))
    return out.reshape(B, Cout, 2 * H, 2 * W)


# --------------------------------------------------------------------------------------
# Demo / correctness check
# --------------------------------------------------------------------------------------
if __name__ == "__main__":
    key = jax.random.PRNGKey(0)
    kx, kw, kb = jax.random.split(key, 3)

    B, Cin, H, W = 2, 4, 16, 16
    Cout = 8  # dim_out

    x = jax.random.normal(kx, (B, Cin, H, W), dtype=jnp.float32)
    fan_in = Cin * 3 * 3
    bound = 1.0 / (fan_in ** 0.5)
    weight = jax.random.uniform(kw, (Cout, Cin, 3, 3), jnp.float32, -bound, bound)
    bias = jax.random.uniform(kb, (Cout,), jnp.float32, -bound, bound)

    try:
        out = jax.block_until_ready(upsample_forward(x, weight, bias, fold_taps=True))
    except Exception:
        # TODO(synk): folded-K path relies on minor-dim concat in Mosaic; fall back to the
        # per-tap accumulation kernel if this jax version rejects that lowering.
        out = jax.block_until_ready(upsample_forward(x, weight, bias, fold_taps=False))

    # pure-JAX reference: nearest 2x upsample + 3x3 conv (padding=1)
    up_ref = jnp.repeat(jnp.repeat(x, 2, axis=2), 2, axis=3)
    ref = jax.lax.conv_general_dilated(
        up_ref, weight, window_strides=(1, 1), padding=((1, 1), (1, 1)),
        dimension_numbers=("NCHW", "OIHW", "NCHW"),
    ) + bias[None, :, None, None]

    assert out.shape == (B, Cout, 2 * H, 2 * W), out.shape
    assert jnp.allclose(out, ref, atol=1e-4, rtol=1e-4), float(jnp.abs(out - ref).max())
    print("KERNEL_OK")
</pallas_src>

<mosaic_0001>
module attributes {stable_mosaic.version = 11 : i64} {
  func.func @_upsample_conv_kernel_folded(%arg0: i32, %arg1: i32, %arg2: memref<1x8x18x4xf32, #tpu.memory_space<vmem>>, %arg3: memref<1x8x18x4xf32, #tpu.memory_space<vmem>>, %arg4: memref<36x128xf32, #tpu.memory_space<vmem>>, %arg5: memref<1x128xf32, #tpu.memory_space<vmem>>, %arg6: memref<1x128x128xf32, #tpu.memory_space<vmem>>) attributes {dimension_semantics = [#tpu.dimension_semantics<parallel>, #tpu.dimension_semantics<parallel>], iteration_bounds = array<i64: 2, 2>, scalar_prefetch = 0 : i64, scratch_operands = 0 : i64, tpu.core_type = #tpu.core_type<tc>, window_params = [{transform_indices = @transform_0, window_bounds = array<i64: 1, 8, 18, 4>}, {transform_indices = @transform_1, window_bounds = array<i64: 1, 8, 18, 4>}, {pipeline_mode = #tpu.pipeline_mode<synchronous>, transform_indices = @transform_2, window_bounds = array<i64: 36, 128>}, {pipeline_mode = #tpu.pipeline_mode<synchronous>, transform_indices = @transform_3, window_bounds = array<i64: 1, 128>}, {transform_indices = @transform_4, window_bounds = array<i64: 1, 128, 128>}]} {
    %c0 = arith.constant 0 : index
    %c0_0 = arith.constant 0 : index
    %c0_1 = arith.constant 0 : index
    %c0_2 = arith.constant 0 : index
    %0 = vector.load %arg2[%c0, %c0_0, %c0_1, %c0_2] : memref<1x8x18x4xf32, #tpu.memory_space<vmem>>, vector<1x8x18x4xf32>
    %1 = vector.shape_cast %0 : vector<1x8x18x4xf32> to vector<8x18x4xf32>
    %c0_3 = arith.constant 0 : index
    %c0_4 = arith.constant 0 : index
    %c0_5 = arith.constant 0 : index
    %c0_6 = arith.constant 0 : index
    %2 = vector.load %arg3[%c0_3, %c0_4, %c0_5, %c0_6] : memref<1x8x18x4xf32, #tpu.memory_space<vmem>>, vector<1x2x18x4xf32>
    %3 = vector.shape_cast %2 : vector<1x2x18x4xf32> to vector<2x18x4xf32>
    %4 = tpu.concatenate %1, %3 in 0 : vector<8x18x4xf32>, vector<2x18x4xf32> -> vector<10x18x4xf32>
    %5 = vector.extract_strided_slice %4 {offsets = [0, 0, 0], sizes = [8, 16, 4], strides = [1, 1, 1]} : vector<10x18x4xf32> to vector<8x16x4xf32>
    %6 = vector.shape_cast %5 : vector<8x16x4xf32> to vector<128x4xf32>
    %7 = vector.extract_strided_slice %4 {offsets = [0, 1, 0], sizes = [8, 16, 4], strides = [1, 1, 1]} : vector<10x18x4xf32> to vector<8x16x4xf32>
    %8 = vector.shape_cast %7 : vector<8x16x4xf32> to vector<128x4xf32>
    %9 = vector.extract_strided_slice %4 {offsets = [0, 2, 0], sizes = [8, 16, 4], strides = [1, 1, 1]} : vector<10x18x4xf32> to vector<8x16x4xf32>
    %10 = vector.shape_cast %9 : vector<8x16x4xf32> to vector<128x4xf32>
    %11 = vector.extract_strided_slice %4 {offsets = [1, 0, 0], sizes = [8, 16, 4], strides = [1, 1, 1]} : vector<10x18x4xf32> to vector<8x16x4xf32>
    %12 = vector.shape_cast %11 : vector<8x16x4xf32> to vector<128x4xf32>
    %13 = vector.extract_strided_slice %4 {offsets = [1, 1, 0], sizes = [8, 16, 4], strides = [1, 1, 1]} : vector<10x18x4xf32> to vector<8x16x4xf32>
    %14 = vector.shape_cast %13 : vector<8x16x4xf32> to vector<128x4xf32>
    %15 = vector.extract_strided_slice %4 {offsets = [1, 2, 0], sizes = [8, 16, 4], strides = [1, 1, 1]} : vector<10x18x4xf32> to vector<8x16x4xf32>
    %16 = vector.shape_cast %15 : vector<8x16x4xf32> to vector<128x4xf32>
    %17 = vector.extract_strided_slice %4 {offsets = [2, 0, 0], sizes = [8, 16, 4], strides = [1, 1, 1]} : vector<10x18x4xf32> to vector<8x16x4xf32>
    %18 = vector.shape_cast %17 : vector<8x16x4xf32> to vector<128x4xf32>
    %19 = vector.extract_strided_slice %4 {offsets = [2, 1, 0], sizes = [8, 16, 4], strides = [1, 1, 1]} : vector<10x18x4xf32> to vector<8x16x4xf32>
    %20 = vector.shape_cast %19 : vector<8x16x4xf32> to vector<128x4xf32>
    %21 = vector.extract_strided_slice %4 {offsets = [2, 2, 0], sizes = [8, 16, 4], strides = [1, 1, 1]} : vector<10x18x4xf32> to vector<8x16x4xf32>
    %22 = vector.shape_cast %21 : vector<8x16x4xf32> to vector<128x4xf32>
    %23 = tpu.concatenate %6, %8, %10, %12, %14, %16, %18, %20, %22 in 1 : vector<128x4xf32>, vector<128x4xf32>, vector<128x4xf32>, vector<128x4xf32>, vector<128x4xf32>, vector<128x4xf32>, vector<128x4xf32>, vector<128x4xf32>, vector<128x4xf32> -> vector<128x36xf32>
    %c0_7 = arith.constant 0 : index
    %c0_8 = arith.constant 0 : index
    %24 = vector.load %arg4[%c0_7, %c0_8] : memref<36x128xf32, #tpu.memory_space<vmem>>, vector<36x128xf32>
    %cst = arith.constant dense<0.000000e+00> : vector<128x128xf32>
    %25 = tpu.matmul %23, %24, %cst {dimension_numbers = #tpu.dot_dimension_numbers<[1], [0], [0], [1], [0, 0, 1, 1], [], []>} : vector<128x36xf32>, vector<36x128xf32>, vector<128x128xf32> -> vector<128x128xf32>
    %c0_9 = arith.constant 0 : index
    %c0_10 = arith.constant 0 : index
    %26 = vector.load %arg5[%c0_9, %c0_10] : memref<1x128xf32, #tpu.memory_space<vmem>>, vector<1x128xf32>
    %27 = vector.broadcast %26 : vector<1x128xf32> to vector<128x128xf32>
    %28 = arith.addf %25, %27 : vector<128x128xf32>
    %c0_11 = arith.constant 0 : index
    %c0_12 = arith.constant 0 : index
    %c0_13 = arith.constant 0 : index
    %29 = vector.load %arg6[%c0_11, %c0_12, %c0_13] : memref<1x128x128xf32, #tpu.memory_space<vmem>>, vector<1x128x128xf32>
    %30 = vector.shape_cast %29 : vector<1x128x128xf32> to vector<128x128xf32>
    %31 = vector.shape_cast %28 : vector<128x128xf32> to vector<1x128x128xf32>
    tpu.vector_store %arg6[%c0_11, %c0_12, %c0_13], %31 {strides = array<i32>} : memref<1x128x128xf32, #tpu.memory_space<vmem>>, vector<1x128x128xf32>,
    return
  }
  func.func @transform_0(%arg0: i32, %arg1: i32) -> (i32, i32, i32, i32) {
    %c0_i32 = arith.constant 0 : i32
    %c0_i32_0 = arith.constant 0 : i32
    %c0_i32_1 = arith.constant 0 : i32
    return %arg0, %arg1, %c0_i32, %c0_i32_0 : i32, i32, i32, i32
  }
  func.func @transform_1(%arg0: i32, %arg1: i32) -> (i32, i32, i32, i32) {
    %c1_i32 = arith.constant 1 : i32
    %0 = arith.addi %arg1, %c1_i32 : i32
    %c1_i32_0 = arith.constant 1 : i32
    %1 = arith.muli %0, %c1_i32_0 : i32
    %c0_i32 = arith.constant 0 : i32
    %c0_i32_1 = arith.constant 0 : i32
    %c0_i32_2 = arith.constant 0 : i32
    return %arg0, %1, %c0_i32, %c0_i32_1 : i32, i32, i32, i32
  }
  func.func @transform_2(%arg0: i32, %arg1: i32) -> (i32, i32) {
    %c0_i32 = arith.constant 0 : i32
    %c0_i32_0 = arith.constant 0 : i32
    %c0_i32_1 = arith.constant 0 : i32
    return %c0_i32, %c0_i32_0 : i32, i32
  }
  func.func @transform_3(%arg0: i32, %arg1: i32) -> (i32, i32) {
    %c0_i32 = arith.constant 0 : i32
    %c0_i32_0 = arith.constant 0 : i32
    %c0_i32_1 = arith.constant 0 : i32
    return %c0_i32, %c0_i32_0 : i32, i32
  }
  func.func @transform_4(%arg0: i32, %arg1: i32) -> (i32, i32, i32) {
    %c0_i32 = arith.constant 0 : i32
    %c0_i32_0 = arith.constant 0 : i32
    return %arg0, %arg1, %c0_i32 : i32, i32, i32
  }
}

module attributes {stable_mosaic.version = 11 : i64} {
  func.func @_upsample_conv_kernel_pertap(%arg0: i32, %arg1: i32, %arg2: memref<1x8x18x4xf32, #tpu.memory_space<vmem>>, %arg3: memref<1x8x18x4xf32, #tpu.memory_space<vmem>>, %arg4: memref<36x128xf32, #tpu.memory_space<vmem>>, %arg5: memref<1x128xf32, #tpu.memory_space<vmem>>, %arg6: memref<1x128x128xf32, #tpu.memory_space<vmem>>) attributes {dimension_semantics = [#tpu.dimension_semantics<parallel>, #tpu.dimension_semantics<parallel>], iteration_bounds = array<i64: 2, 2>, scalar_prefetch = 0 : i64, scratch_operands = 0 : i64, tpu.core_type = #tpu.core_type<tc>, window_params = [{transform_indices = @transform_0, window_bounds = array<i64: 1, 8, 18, 4>}, {transform_indices = @transform_1, window_bounds = array<i64: 1, 8, 18, 4>}, {pipeline_mode = #tpu.pipeline_mode<synchronous>, transform_indices = @transform_2, window_bounds = array<i64: 36, 128>}, {pipeline_mode = #tpu.pipeline_mode<synchronous>, transform_indices = @transform_3, window_bounds = array<i64: 1, 128>}, {transform_indices = @transform_4, window_bounds = array<i64: 1, 128, 128>}]} {
    %c0 = arith.constant 0 : index
    %c0_0 = arith.constant 0 : index
    %c0_1 = arith.constant 0 : index
    %c0_2 = arith.constant 0 : index
    %0 = vector.load %arg2[%c0, %c0_0, %c0_1, %c0_2] : memref<1x8x18x4xf32, #tpu.memory_space<vmem>>, vector<1x8x18x4xf32>
    %1 = vector.shape_cast %0 : vector<1x8x18x4xf32> to vector<8x18x4xf32>
    %c0_3 = arith.constant 0 : index
    %c0_4 = arith.constant 0 : index
    %c0_5 = arith.constant 0 : index
    %c0_6 = arith.constant 0 : index
    %2 = vector.load %arg3[%c0_3, %c0_4, %c0_5, %c0_6] : memref<1x8x18x4xf32, #tpu.memory_space<vmem>>, vector<1x2x18x4xf32>
    %3 = vector.shape_cast %2 : vector<1x2x18x4xf32> to vector<2x18x4xf32>
    %4 = tpu.concatenate %1, %3 in 0 : vector<8x18x4xf32>, vector<2x18x4xf32> -> vector<10x18x4xf32>
    %5 = vector.extract_strided_slice %4 {offsets = [0, 0, 0], sizes = [8, 16, 4], strides = [1, 1, 1]} : vector<10x18x4xf32> to vector<8x16x4xf32>
    %6 = vector.shape_cast %5 : vector<8x16x4xf32> to vector<128x4xf32>
    %7 = vector.extract_strided_slice %4 {offsets = [0, 1, 0], sizes = [8, 16, 4], strides = [1, 1, 1]} : vector<10x18x4xf32> to vector<8x16x4xf32>
    %8 = vector.shape_cast %7 : vector<8x16x4xf32> to vector<128x4xf32>
    %9 = vector.extract_strided_slice %4 {offsets = [0, 2, 0], sizes = [8, 16, 4], strides = [1, 1, 1]} : vector<10x18x4xf32> to vector<8x16x4xf32>
    %10 = vector.shape_cast %9 : vector<8x16x4xf32> to vector<128x4xf32>
    %11 = vector.extract_strided_slice %4 {offsets = [1, 0, 0], sizes = [8, 16, 4], strides = [1, 1, 1]} : vector<10x18x4xf32> to vector<8x16x4xf32>
    %12 = vector.shape_cast %11 : vector<8x16x4xf32> to vector<128x4xf32>
    %13 = vector.extract_strided_slice %4 {offsets = [1, 1, 0], sizes = [8, 16, 4], strides = [1, 1, 1]} : vector<10x18x4xf32> to vector<8x16x4xf32>
    %14 = vector.shape_cast %13 : vector<8x16x4xf32> to vector<128x4xf32>
    %15 = vector.extract_strided_slice %4 {offsets = [1, 2, 0], sizes = [8, 16, 4], strides = [1, 1, 1]} : vector<10x18x4xf32> to vector<8x16x4xf32>
    %16 = vector.shape_cast %15 : vector<8x16x4xf32> to vector<128x4xf32>
    %17 = vector.extract_strided_slice %4 {offsets = [2, 0, 0], sizes = [8, 16, 4], strides = [1, 1, 1]} : vector<10x18x4xf32> to vector<8x16x4xf32>
    %18 = vector.shape_cast %17 : vector<8x16x4xf32> to vector<128x4xf32>
    %19 = vector.extract_strided_slice %4 {offsets = [2, 1, 0], sizes = [8, 16, 4], strides = [1, 1, 1]} : vector<10x18x4xf32> to vector<8x16x4xf32>
    %20 = vector.shape_cast %19 : vector<8x16x4xf32> to vector<128x4xf32>
    %21 = vector.extract_strided_slice %4 {offsets = [2, 2, 0], sizes = [8, 16, 4], strides = [1, 1, 1]} : vector<10x18x4xf32> to vector<8x16x4xf32>
    %22 = vector.shape_cast %21 : vector<8x16x4xf32> to vector<128x4xf32>
    %c0_7 = arith.constant 0 : index
    %c0_8 = arith.constant 0 : index
    %23 = vector.load %arg4[%c0_7, %c0_8] : memref<36x128xf32, #tpu.memory_space<vmem>>, vector<36x128xf32>
    %cst = arith.constant 0.000000e+00 : f32
    %24 = vector.broadcast %cst : f32 to vector<128x128xf32>
    %25 = vector.extract_strided_slice %23 {offsets = [0, 0], sizes = [4, 128], strides = [1, 1]} : vector<36x128xf32> to vector<4x128xf32>
    %cst_9 = arith.constant dense<0.000000e+00> : vector<128x128xf32>
    %26 = tpu.matmul %6, %25, %cst_9 {dimension_numbers = #tpu.dot_dimension_numbers<[1], [0], [0], [1], [0, 0, 1, 1], [], []>} : vector<128x4xf32>, vector<4x128xf32>, vector<128x128xf32> -> vector<128x128xf32>
    %27 = arith.addf %24, %26 : vector<128x128xf32>
    %28 = vector.extract_strided_slice %23 {offsets = [4, 0], sizes = [4, 128], strides = [1, 1]} : vector<36x128xf32> to vector<4x128xf32>
    %cst_10 = arith.constant dense<0.000000e+00> : vector<128x128xf32>
    %29 = tpu.matmul %8, %28, %cst_10 {dimension_numbers = #tpu.dot_dimension_numbers<[1], [0], [0], [1], [0, 0, 1, 1], [], []>} : vector<128x4xf32>, vector<4x128xf32>, vector<128x128xf32> -> vector<128x128xf32>
    %30 = arith.addf %27, %29 : vector<128x128xf32>
    %31 = vector.extract_strided_slice %23 {offsets = [8, 0], sizes = [4, 128], strides = [1, 1]} : vector<36x128xf32> to vector<4x128xf32>
    %cst_11 = arith.constant dense<0.000000e+00> : vector<128x128xf32>
    %32 = tpu.matmul %10, %31, %cst_11 {dimension_numbers = #tpu.dot_dimension_numbers<[1], [0], [0], [1], [0, 0, 1, 1], [], []>} : vector<128x4xf32>, vector<4x128xf32>, vector<128x128xf32> -> vector<128x128xf32>
    %33 = arith.addf %30, %32 : vector<128x128xf32>
    %34 = vector.extract_strided_slice %23 {offsets = [12, 0], sizes = [4, 128], strides = [1, 1]} : vector<36x128xf32> to vector<4x128xf32>
    %cst_12 = arith.constant dense<0.000000e+00> : vector<128x128xf32>
    %35 = tpu.matmul %12, %34, %cst_12 {dimension_numbers = #tpu.dot_dimension_numbers<[1], [0], [0], [1], [0, 0, 1, 1], [], []>} : vector<128x4xf32>, vector<4x128xf32>, vector<128x128xf32> -> vector<128x128xf32>
    %36 = arith.addf %33, %35 : vector<128x128xf32>
    %37 = vector.extract_strided_slice %23 {offsets = [16, 0], sizes = [4, 128], strides = [1, 1]} : vector<36x128xf32> to vector<4x128xf32>
    %cst_13 = arith.constant dense<0.000000e+00> : vector<128x128xf32>
    %38 = tpu.matmul %14, %37, %cst_13 {dimension_numbers = #tpu.dot_dimension_numbers<[1], [0], [0], [1], [0, 0, 1, 1], [], []>} : vector<128x4xf32>, vector<4x128xf32>, vector<128x128xf32> -> vector<128x128xf32>
    %39 = arith.addf %36, %38 : vector<128x128xf32>
    %40 = vector.extract_strided_slice %23 {offsets = [20, 0], sizes = [4, 128], strides = [1, 1]} : vector<36x128xf32> to vector<4x128xf32>
    %cst_14 = arith.constant dense<0.000000e+00> : vector<128x128xf32>
    %41 = tpu.matmul %16, %40, %cst_14 {dimension_numbers = #tpu.dot_dimension_numbers<[1], [0], [0], [1], [0, 0, 1, 1], [], []>} : vector<128x4xf32>, vector<4x128xf32>, vector<128x128xf32> -> vector<128x128xf32>
    %42 = arith.addf %39, %41 : vector<128x128xf32>
    %43 = vector.extract_strided_slice %23 {offsets = [24, 0], sizes = [4, 128], strides = [1, 1]} : vector<36x128xf32> to vector<4x128xf32>
    %cst_15 = arith.constant dense<0.000000e+00> : vector<128x128xf32>
    %44 = tpu.matmul %18, %43, %cst_15 {dimension_numbers = #tpu.dot_dimension_numbers<[1], [0], [0], [1], [0, 0, 1, 1], [], []>} : vector<128x4xf32>, vector<4x128xf32>, vector<128x128xf32> -> vector<128x128xf32>
    %45 = arith.addf %42, %44 : vector<128x128xf32>
    %46 = vector.extract_strided_slice %23 {offsets = [28, 0], sizes = [4, 128], strides = [1, 1]} : vector<36x128xf32> to vector<4x128xf32>
    %cst_16 = arith.constant dense<0.000000e+00> : vector<128x128xf32>
    %47 = tpu.matmul %20, %46, %cst_16 {dimension_numbers = #tpu.dot_dimension_numbers<[1], [0], [0], [1], [0, 0, 1, 1], [], []>} : vector<128x4xf32>, vector<4x128xf32>, vector<128x128xf32> -> vector<128x128xf32>
    %48 = arith.addf %45, %47 : vector<128x128xf32>
    %49 = vector.extract_strided_slice %23 {offsets = [32, 0], sizes = [4, 128], strides = [1, 1]} : vector<36x128xf32> to vector<4x128xf32>
    %cst_17 = arith.constant dense<0.000000e+00> : vector<128x128xf32>
    %50 = tpu.matmul %22, %49, %cst_17 {dimension_numbers = #tpu.dot_dimension_numbers<[1], [0], [0], [1], [0, 0, 1, 1], [], []>} : vector<128x4xf32>, vector<4x128xf32>, vector<128x128xf32> -> vector<128x128xf32>
    %51 = arith.addf %48, %50 : vector<128x128xf32>
    %c0_18 = arith.constant 0 : index
    %c0_19 = arith.constant 0 : index
    %52 = vector.load %arg5[%c0_18, %c0_19] : memref<1x128xf32, #tpu.memory_space<vmem>>, vector<1x128xf32>
    %53 = vector.broadcast %52 : vector<1x128xf32> to vector<128x128xf32>
    %54 = arith.addf %51, %53 : vector<128x128xf32>
    %c0_20 = arith.constant 0 : index
    %c0_21 = arith.constant 0 : index
    %c0_22 = arith.constant 0 : index
    %55 = vector.load %arg6[%c0_20, %c0_21, %c0_22] : memref<1x128x128xf32, #tpu.memory_space<vmem>>, vector<1x128x128xf32>
    %56 = vector.shape_cast %55 : vector<1x128x128xf32> to vector<128x128xf32>
    %57 = vector.shape_cast %54 : vector<128x128xf32> to vector<1x128x128xf32>
    tpu.vector_store %arg6[%c0_20, %c0_21, %c0_22], %57 {strides = array<i32>} : memref<1x128x128xf32, #tpu.memory_space<vmem>>, vector<1x128x128xf32>,
    return
  }
  func.func @transform_0(%arg0: i32, %arg1: i32) -> (i32, i32, i32, i32) {
    %c0_i32 = arith.constant 0 : i32
    %c0_i32_0 = arith.constant 0 : i32
    %c0_i32_1 = arith.constant 0 : i32
    return %arg0, %arg1, %c0_i32, %c0_i32_0 : i32, i32, i32, i32
  }
  func.func @transform_1(%arg0: i32, %arg1: i32) -> (i32, i32, i32, i32) {
    %c1_i32 = arith.constant 1 : i32
    %0 = arith.addi %arg1, %c1_i32 : i32
    %c1_i32_0 = arith.constant 1 : i32
    %1 = arith.muli %0, %c1_i32_0 : i32
    %c0_i32 = arith.constant 0 : i32
    %c0_i32_1 = arith.constant 0 : i32
    %c0_i32_2 = arith.constant 0 : i32
    return %arg0, %1, %c0_i32, %c0_i32_1 : i32, i32, i32, i32
  }
  func.func @transform_2(%arg0: i32, %arg1: i32) -> (i32, i32) {
    %c0_i32 = arith.constant 0 : i32
    %c0_i32_0 = arith.constant 0 : i32
    %c0_i32_1 = arith.constant 0 : i32
    return %c0_i32, %c0_i32_0 : i32, i32
  }
  func.func @transform_3(%arg0: i32, %arg1: i32) -> (i32, i32) {
    %c0_i32 = arith.constant 0 : i32
    %c0_i32_0 = arith.constant 0 : i32
    %c0_i32_1 = arith.constant 0 : i32
    return %c0_i32, %c0_i32_0 : i32, i32
  }
  func.func @transform_4(%arg0: i32, %arg1: i32) -> (i32, i32, i32) {
    %c0_i32 = arith.constant 0 : i32
    %c0_i32_0 = arith.constant 0 : i32
    return %arg0, %arg1, %c0_i32 : i32, i32, i32
  }
}

</mosaic_0001>

<bundles_post_ra>
// kernel: upsample_forward.1
= control target key start
LH: loop header
LB: loop body
LE: loop exit
PB: predicated region body
PF: predicated region fallthrough
CT: control target
= control target key end

     0   :  { %s1535_s15 = smov 0   ;;  %s1537_s16 = smov 0   ;;  %s2275_s0 = inlined_call_operand.vmem [shape: f32[2,24,18,4], index: 0, kind: input, shape index: {}, may-alias: {0,1}]   ;;  %s2276_s1 = inlined_call_operand.vmem [shape: f32[2,24,18,4], index: 1, kind: input, shape index: {}, may-alias: {0,1}]   ;;  %s2277_s2 = inlined_call_operand.vmem [shape: f32[36,128], index: 2, kind: input, shape index: {}]   ;;  %s2278_s3 = inlined_call_operand.vmem [shape: f32[1,128], index: 3, kind: input, shape index: {}]   ;;  %s2279_s4 = inlined_call_operand.vmem [shape: f32[2,256,128], index: 4, kind: output, shape index: {}]  }
   0x1   :  { %s1539_s17 = smov 0   ;;  %s1541_s18 = smov 0  }
   0x2   :  { %s1543_s19 = smov 0  }
   0x3 LB: > { %s23_s20 = sadd.s32 1, %s1492_s17  ;;  %s26_s21 = sadd.s32 1, %s1496_s18  ;;  %s1500_s19 = sphi %s1543_s19, %s14_s19   ;;  %s1496_s18 = sphi %s1541_s18, %s2310_s18   ;;  %s1492_s17 = sphi %s1539_s17, %s2309_s17   ;;  %s1488_s16 = sphi %s1537_s16, %s2308_s16   ;;  %s1484_s15 = sphi %s1535_s15, %s2307_s15  }
   0x4   : > { %p24_p0 = scmp.ge.s32.totalorder %s23_s20, 2  ;;  %p1312_p1 = scmp.ge.s32.totalorder %s1500_s19, 1 }
   0x5   : > { %p206_p2 = scmp.lt.s32.totalorder %s1500_s19, 5 }
   0x6   : > { %s2312_s20 = smov (%p24_p0, %s23_s20), 0  ;;  %s2314_s21 = smov (!%p24_p0, %s26_s21), %s1496_s18 }
   0x7   : > { %p207_p3 = pnand %p1312_p1, %p206_p2  ;;  %p28_p4 = scmp.ge.s32.totalorder %s2314_s21, 2 }
   0x9   : > { %s2316_s21 = smov (%p28_p4, %s2314_s21), 0  ;;  %210 = sbr.rel (%p207_p3) target bundleno = 615 (0x267), region = 36 }
  0x10   : > { %s1568_s22 = sshll.u32 %s1484_s15, 3  ;;  %p253_p5 = scmp.lt.s32.totalorder %s1488_s16, 1  ;;  %vm340_vm0 = vcmask 1046528   ;;  %vm381_vm1 = vcmask 1045504   ;;  %vm1029_vm2 = vcmask 1043456   ;;  %vm832_vm3 = vcmask 31744  }
  0x11   : > { %p255_p6 = scmp.lt.s32.totalorder %s1568_s22, 23  ;;  %s1502_s5 = smov 4   ;;  %vm849_vm4 = vcmask 64512   ;;  %vm866_vm5 = vcmask 97280   ;;  %vm883_vm6 = vcmask 130048   ;;  %vm900_vm7 = vcmask 162816  }
  0x12   : > { %s2318_s16 = smov (!%p253_p5, %s1488_s16), 1  ;;  %s1503_s6 = smov 8   ;;  %vm917_vm8 = vcmask 195584   ;;  %vm934_vm9 = vcmask 228352   ;;  %vm951_vm10 = vcmask 261120   ;;  %vm980_vm11 = vcmask 293888  }
  0x13   : > { %s256_s23 = scalar_select %p255_p6, %s1568_s22, 23 }
  0x14   : > { %s1412_s24 = smul.u32 72, %s2318_s16  ;;  %s1504_s7 = smov 12  }
  0x15   : > { %s1411_s25 = smul.u32 3, %s256_s23  ;;  %s1505_s8 = smov 16  }
  0x16   : > { %s1506_s9 = smov 20   ;;  %s1341_s10 = sadd.s32 8, %s1568_s22 }
  0x17   : > { %s259_s26 = sadd.s32 %s1412_s24, %s1411_s25  ;;  %p267_p7 = scmp.lt.s32.totalorder %s1341_s10, 23 }
  0x18   : > { %s1314_s27 = sshll.u32 %s259_s26, 3  ;;  %s1507_s13 = smov 24  }
  0x19   : > { %s1580_s30 = scalar_lea.vmem %s2275_s0, %s1314_s27  ;;  %s2320_s10 = smov (!%p267_p7, %s1341_s10), 23 }
  0x1a   : > { %v1583_v0 = vld [vmem:[%s1580_s30 + $0x8] sm:$0xff]  ;;  %v288_v1 = vld [vmem:[%s1580_s30 + $0x10] sm:$0x3]  ;;  %v1587_v2 = vld [vmem:[%s1580_s30] sm:$0xff]  ;;  %s1413_s11 = smul.u32 3, %s2320_s10  ;;  %s1508_s14 = smov 28  }
  0x1b   : > { %v342_v3 = vrot.slane %v1583_v0, 1  ;;  %v344_v4 = vrot.slane %v288_v1, 1  ;;  %v341_v5 = vrot.slane %v1587_v2, 1  ;;  %v1592_v6 = vld [vmem:[%s1580_s30 + $0x68] sm:$0xff]  ;;  %v300_v7 = vld [vmem:[%s1580_s30 + $0x70] sm:$0x3] }
  0x1c   : > { %v362_v8 = vrot.slane %v1592_v6, 1  ;;  %v364_v9 = vrot.slane %v300_v7, 1  ;;  %v1597_v10 = vld [vmem:[%s1580_s30 + $0x60] sm:$0xff]  ;;  %v403_v14 = vrot.slane %v1592_v6, 2  ;;  %v382_v15 = vrot.slane %v1587_v2, 2  ;;  %v1633_v26 = vld [vmem:[%s1580_s30 + $0x78] sm:$0xff]  ;;  %s1702_s12 = sadd.s32 %s1413_s11, %s1412_s24 }
  0x1d   : > { %v345_v11 = vsel %vm340_vm0, %v342_v3, %v344_v4  ;;  %v343_v12 = vsel %vm340_vm0, %v341_v5, %v342_v3  ;;  %v361_v13 = vrot.slane %v1597_v10, 1  ;;  %v402_v18 = vrot.slane %v1597_v10, 2  ;;  %v1636_v27 = vld [vmem:[%s1580_s30 + $0x18] sm:$0xff]  ;;  %v1639_v28 = vld [vmem:[%s1580_s30 + $0x80] sm:$0xff]  ;;  %v303_v36 = vld [vmem:[%s1580_s30 + $0x88] sm:$0x3] }
  0x1e   : > { %450 = vrot.lane.b32.xlu1 %v345_v11, %s1502_s5  ;;  %448 = vrot.lane.b32.xlu0 %v343_v12, %s1502_s5  ;;  %v1607_v16 = vsel %vm340_vm0, %v362_v8, %v364_v9  ;;  %v383_v19 = vrot.slane %v1583_v0, 2  ;;  %v405_v22 = vrot.slane %v300_v7, 2  ;;  %v385_v23 = vrot.slane %v288_v1, 2  ;;  %v1642_v29 = vld [vmem:[%s1580_s30 + $0x20] sm:$0xff]  ;;  %v291_v37 = vld [vmem:[%s1580_s30 + $0x28] sm:$0x3] }
  0x1f   : > { %v1610_v17 = vsel %vm340_vm0, %v361_v13, %v362_v8  ;;  %v1619_v20 = vsel %vm381_vm1, %v402_v18, %v403_v14  ;;  %v366_v30 = vrot.slane %v1633_v26, 1  ;;  %v367_v31 = vrot.slane %v1639_v28, 1  ;;  %v1705_v52 = vld [vmem:[%s1580_s30 + $0x90] sm:$0xff]  ;;  %v1718_v54 = vld [vmem:[%s1580_s30 + $0x98] sm:$0xff]  ;;  %v306_v62 = vld [vmem:[%s1580_s30 + $0xa0] sm:$0x3] }
  0x20   : > { %v384_v21 = vsel %vm381_vm1, %v382_v15, %v383_v19  ;;  %v1626_v24 = vsel %vm381_vm1, %v403_v14, %v405_v22  ;;  %v386_v25 = vsel %vm381_vm1, %v383_v19, %v385_v23  ;;  %v346_v32 = vrot.slane %v1636_v27, 1  ;;  %v1708_v53 = vld [vmem:[%s1580_s30 + $0x30] sm:$0xff]  ;;  %v1721_v55 = vld [vmem:[%s1580_s30 + $0x38] sm:$0xff]  ;;  %v294_v63 = vld [vmem:[%s1580_s30 + $0x40] sm:$0x3]  ;;  %s1509_s10 = smov 32  }
  0x21   : > { %v347_v33 = vrot.slane %v1642_v29, 1  ;;  %v1657_v34 = vsel %vm340_vm0, %v366_v30, %v367_v31  ;;  %v369_v38 = vrot.slane %v303_v36, 1  ;;  %v349_v39 = vrot.slane %v291_v37, 1  ;;  %2293 = vst [vmem:[#allocation6_spill] sm:$0xff] %v1721_v55  ;;  %v968_v8 = vld [vmem:[%s2277_s2] sm:$0xff]  ;;  %v969_v9 = vld [vmem:[%s2277_s2 + $0x8] sm:$0xff] }
  0x22   : > { %466 = vrot.lane.b32.xlu1 %v1607_v16, %s1502_s5  ;;  %464 = vrot.lane.b32.xlu0 %v1610_v17, %s1502_s5  ;;  %2289 = vst [vmem:[#allocation2_spill] sm:$0xff] %v1657_v34  ;;  %v407_v40 = vrot.slane %v1633_v26, 2  ;;  %v408_v41 = vrot.slane %v1639_v28, 2  ;;  %v387_v44 = vrot.slane %v1636_v27, 2  ;;  %v388_v45 = vrot.slane %v1642_v29, 2  ;;  %v970_v15 = vld [vmem:[%s2277_s2 + $0x10] sm:$0xff] }
  0x23   : > { %v348_v35 = vsel %vm340_vm0, %v346_v32, %v347_v33  ;;  %v1671_v42 = vsel %vm340_vm0, %v367_v31, %v369_v38  ;;  %v350_v43 = vsel %vm340_vm0, %v347_v33, %v349_v39  ;;  %v410_v48 = vrot.slane %v303_v36, 2  ;;  %v971_v18 = vld [vmem:[%s2277_s2 + $0x18] sm:$0xff]  ;;  %v972_v23 = vld [vmem:[%s2277_s2 + $0x20] sm:$0xf]  ;;  %v1791_v33 = vld [vmem:[%s1580_s30 + $0xa8] sm:$0xff] }
  0x24   : > { %2290 = vst [vmem:[#allocation3_spill] sm:$0xff] %v1671_v42  ;;  %v1680_v46 = vsel %vm381_vm1, %v407_v40, %v408_v41  ;;  %v389_v47 = vsel %vm381_vm1, %v387_v44, %v388_v45  ;;  %v390_v49 = vrot.slane %v291_v37, 2  ;;  %v371_v56 = vrot.slane %v1705_v52, 1  ;;  %2294 = vst [vmem:[#allocation7_spill] sm:$0xff] %v1791_v33  ;;  %v1818_v44 = vld [vmem:[%s1580_s30 + $0x50] sm:$0xff] }
  0x25   : > { %2291 = vst [vmem:[#allocation4_spill] sm:$0xff] %v1680_v46  ;;  %v1694_v50 = vsel %vm381_vm1, %v408_v41, %v410_v48  ;;  %v372_v57 = vrot.slane %v1718_v54, 1  ;;  %v351_v58 = vrot.slane %v1708_v53, 1  ;;  %v352_v59 = vrot.slane %v1721_v55, 1  ;;  %2297 = vst [vmem:[#allocation10_spill] sm:$0xff] %v1818_v44 }
  0x26   : > { %512 = vrot.lane.b32.xlu1 %v1619_v20, %s1503_s6  ;;  %496 = vrot.lane.b32.xlu0 %v384_v21, %s1503_s6  ;;  %2292 = vst [vmem:[#allocation5_spill] sm:$0xff] %v1694_v50  ;;  %v391_v51 = vsel %vm381_vm1, %v388_v45, %v390_v49  ;;  %v374_v1 = vrot.slane %v306_v62, 1  ;;  %v354_v3 = vrot.slane %v294_v63, 1  ;;  %v412_v4 = vrot.slane %v1705_v52, 2 }
  0x27   : > { %v373_v60 = vsel %vm340_vm0, %v371_v56, %v372_v57  ;;  %v353_v61 = vsel %vm340_vm0, %v351_v58, %v352_v59  ;;  %v413_v5 = vrot.slane %v1718_v54, 2  ;;  %v392_v7 = vrot.slane %v1708_v53, 2 }
  0x28   : > { %v375_v11 = vsel %vm340_vm0, %v372_v57, %v374_v1  ;;  %v355_v12 = vsel %vm340_vm0, %v352_v59, %v354_v3  ;;  %v393_v13 = vrot.slane %v1721_v55, 2  ;;  %v1397_v14 = vpack.c.bf16 %v969_v9, %v968_v8 }
  0x29   : > { %v414_v19 = vsel %vm381_vm1, %v412_v4, %v413_v5  ;;  %v1401_v22 = vpack.c.bf16 %v971_v18, %v970_v15  ;;  %v395_v30 = vrot.slane %v294_v63, 2  ;;  %v376_v45 = vrot.slane %v1791_v33, 1 }
  0x2a   : > { %514 = vrot.lane.b32.xlu1 %v1626_v24, %s1503_s6  ;;  %498 = vrot.lane.b32.xlu0 %v386_v25, %s1503_s6  ;;  %v394_v21 = vsel %vm381_vm1, %v392_v7, %v393_v13  ;;  %v415_v25 = vrot.slane %v306_v62, 2  ;;  %v357_v49 = vrot.slane %v1818_v44, 1  ;;  %v297_v62 = vld [vmem:[%s1580_s30 + $0x58] sm:$0x3] }
  0x2b   : > { %1398 = vmatprep.subr.bf16.mxu0 %v1397_v14  ;;  %1405 = vmatprep.subr.bf16.mxu1 %v1397_v14  ;;  %v396_v32 = vsel %vm381_vm1, %v393_v13, %v395_v30  ;;  %v359_v4 = vrot.slane %v297_v62, 1 }
  0x2c   : > { %1400 = vmatpush3.bf16.msra.mxu0 %v1397_v14  ;;  %1408 = vmatpush3.bf16.msra.mxu1 %v1397_v14  ;;  %v416_v31 = vsel %vm381_vm1, %v413_v5, %v415_v25  ;;  %v398_v14 = vrot.slane %v1818_v44, 2 }
  0x2d   : > { %1402 = vmatprep.subr.bf16.mxu0 %v1401_v22  ;;  %1406 = vmatprep.subr.bf16.mxu1 %v1401_v22  ;;  %v360_v9 = vsel %vm340_vm0, %v357_v49, %v359_v4 }
  0x2e   : > { %560 = vrot.lane.b32.xlu1 %v1633_v26, %s1504_s7  ;;  %544 = vrot.lane.b32.xlu0 %v1636_v27, %s1504_s7 }
  0x30   : > { %1404 = vmatpush3.bf16.msra.mxu0 %v1401_v22  ;;  %1409 = vmatpush3.bf16.msra.mxu1 %v1401_v22 }
  0x31   : > { %1371 = vmatprep.subr.msk.mxu0 %vm1029_vm2, %v972_v23  ;;  %1407 = vmatprep.subr.msk.mxu1 %vm1029_vm2, %v972_v23 }
  0x32   : > { %562 = vrot.lane.b32.xlu1 %v1639_v28, %s1504_s7  ;;  %546 = vrot.lane.b32.xlu0 %v1642_v29, %s1504_s7 }
  0x34   : > { %1372 = vmatpush3.msk.msra.mxu0 %vm1029_vm2, %v972_v23  ;;  %1410 = vmatpush3.msk.msra.mxu1 %vm1029_vm2, %v972_v23 }
  0x36   : > { %608 = vrot.lane.b32.xlu1 %v1657_v34, %s1505_s8  ;;  %592 = vrot.lane.b32.xlu0 %v348_v35, %s1505_s8 }
  0x3a   : > { %468 = vrot.lane.b32.xlu1 %v1657_v34, %s1502_s5  ;;  %452 = vrot.lane.b32.xlu0 %v348_v35, %s1502_s5  ;;  %v1794_v35 = vld [vmem:[%s1580_s30 + $0x48] sm:$0xff] }
  0x3b   : > { %2295 = vst [vmem:[#allocation8_spill] sm:$0xff] %v1794_v35  ;;  %v356_v48 = vrot.slane %v1794_v35, 1  ;;  %v397_v13 = vrot.slane %v1794_v35, 2 }
  0x3d   : > { %v358_v58 = vsel %vm340_vm0, %v356_v48, %v357_v49 }
  0x3e   : > { %610 = vrot.lane.b32.xlu1 %v1671_v42, %s1505_s8  ;;  %594 = vrot.lane.b32.xlu0 %v350_v43, %s1505_s8 }
  0x42   : > { %656 = vrot.lane.b32.xlu1 %v1680_v46, %s1506_s9  ;;  %640 = vrot.lane.b32.xlu0 %v389_v47, %s1506_s9 }
  0x46   : > { %470 = vrot.lane.b32.xlu1 %v1671_v42, %s1502_s5  ;;  %454 = vrot.lane.b32.xlu0 %v350_v43, %s1502_s5  ;;  %v1815_v43 = vld [vmem:[%s1580_s30 + $0xb0] sm:$0xff] }
  0x47   : > { %2296 = vst [vmem:[#allocation9_spill] sm:$0xff] %v1815_v43 }
  0x4a   : > { %516 = vrot.lane.b32.xlu1 %v1680_v46, %s1503_s6  ;;  %500 = vrot.lane.b32.xlu0 %v389_v47, %s1503_s6  ;;  %v377_v47 = vrot.slane %v1815_v43, 1 }
  0x4c   : > { %v378_v57 = vsel %vm340_vm0, %v376_v45, %v377_v47 }
  0x4e   : > { %658 = vrot.lane.b32.xlu1 %v1694_v50, %s1506_s9  ;;  %642 = vrot.lane.b32.xlu0 %v391_v51, %s1506_s9 }
  0x52   : > { %704 = vrot.lane.b32.xlu1 %v1705_v52, %s1507_s13  ;;  %688 = vrot.lane.b32.xlu0 %v1708_v53, %s1507_s13 }
  0x56   : > { %518 = vrot.lane.b32.xlu1 %v1694_v50, %s1503_s6  ;;  %502 = vrot.lane.b32.xlu0 %v391_v51, %s1503_s6 }
  0x5a   : > { %564 = vrot.lane.b32.xlu1 %v1705_v52, %s1504_s7  ;;  %548 = vrot.lane.b32.xlu0 %v1708_v53, %s1504_s7 }
  0x5e   : > { %706 = vrot.lane.b32.xlu1 %v1718_v54, %s1507_s13  ;;  %690 = vrot.lane.b32.xlu0 %v1721_v55, %s1507_s13 }
  0x62   : > { %752 = vrot.lane.b32.xlu1 %v373_v60, %s1508_s14  ;;  %736 = vrot.lane.b32.xlu0 %v353_v61, %s1508_s14 }
  0x66   : > { %566 = vrot.lane.b32.xlu1 %v1718_v54, %s1504_s7  ;;  %550 = vrot.lane.b32.xlu0 %v1721_v55, %s1504_s7 }
  0x6a   : > { %612 = vrot.lane.b32.xlu1 %v373_v60, %s1505_s8  ;;  %596 = vrot.lane.b32.xlu0 %v353_v61, %s1505_s8 }
  0x6e   : > { %754 = vrot.lane.b32.xlu1 %v375_v11, %s1508_s14  ;;  %738 = vrot.lane.b32.xlu0 %v355_v12, %s1508_s14 }
  0x72   : > { %800 = vrot.lane.b32.xlu1 %v414_v19, %s1509_s10  ;;  %784 = vrot.lane.b32.xlu0 %v394_v21, %s1509_s10 }
  0x76   : > { %472 = vrot.lane.b32.xlu1 %v373_v60, %s1502_s5  ;;  %456 = vrot.lane.b32.xlu0 %v353_v61, %s1502_s5  ;;  %v309_v61 = vld [vmem:[%s1580_s30 + $0xb8] sm:$0x3]  ;;  %s1316_s30 = sshll.u32 %s1702_s12, 3 }
  0x77   : > { %v379_v3 = vrot.slane %v309_v61, 1  ;;  %v420_v45 = vrot.slane %v309_v61, 2  ;;  %s1914_s25 = scalar_lea.vmem %s2276_s1, %s1316_s30 }
  0x79   : > { %v380_v8 = vsel %vm340_vm0, %v377_v47, %v379_v3  ;;  %v400_v47 = vrot.slane %v297_v62, 2 }
  0x7a   : > { %614 = vrot.lane.b32.xlu1 %v375_v11, %s1505_s8  ;;  %598 = vrot.lane.b32.xlu0 %v355_v12, %s1505_s8 }
  0x7e   : > { %660 = vrot.lane.b32.xlu1 %v414_v19, %s1506_s9  ;;  %644 = vrot.lane.b32.xlu0 %v394_v21, %s1506_s9 }
  0x82   : > { %802 = vrot.lane.b32.xlu1 %v416_v31, %s1509_s10  ;;  %786 = vrot.lane.b32.xlu0 %v396_v32, %s1509_s10 }
  0x86   : > { %474 = vrot.lane.b32.xlu1 %v375_v11, %s1502_s5  ;;  %458 = vrot.lane.b32.xlu0 %v355_v12, %s1502_s5  ;;  %v417_v11 = vrot.slane %v1791_v33, 2  ;;  %v418_v12 = vrot.slane %v1815_v43, 2 }
  0x8a   : > { %520 = vrot.lane.b32.xlu1 %v414_v19, %s1503_s6  ;;  %504 = vrot.lane.b32.xlu0 %v394_v21, %s1503_s6  ;;  %v419_v19 = vsel %vm381_vm1, %v417_v11, %v418_v12  ;;  %v399_v21 = vsel %vm381_vm1, %v397_v13, %v398_v14 }
  0x8e   : > { %662 = vrot.lane.b32.xlu1 %v416_v31, %s1506_s9  ;;  %646 = vrot.lane.b32.xlu0 %v396_v32, %s1506_s9 }
  0x90   : > { %v1796_v36 = vpop.permute.xlu1 %450  ;;  %v1798_v37 = vpop.permute.xlu0 %448 }
  0x92   : > { %708 = vrot.lane.b32.xlu1 %v1791_v33, %s1507_s13  ;;  %692 = vrot.lane.b32.xlu0 %v1794_v35, %s1507_s13 }
  0x94   : > { %v1804_v38 = vpop.permute.xlu1 %466  ;;  %v1806_v39 = vpop.permute.xlu0 %464 }
  0x96   : > { %522 = vrot.lane.b32.xlu1 %v416_v31, %s1503_s6  ;;  %506 = vrot.lane.b32.xlu0 %v396_v32, %s1503_s6 }
  0x98   : > { %v1810_v40 = vpop.permute.xlu1 %512  ;;  %v1812_v41 = vpop.permute.xlu0 %496 }
  0x9a   : > { %568 = vrot.lane.b32.xlu1 %v1791_v33, %s1504_s7  ;;  %552 = vrot.lane.b32.xlu0 %v1794_v35, %s1504_s7 }
  0x9c   : > { %v1828_v51 = vpop.permute.xlu1 %514  ;;  %v1830_v56 = vpop.permute.xlu0 %498 }
  0x9e   : > { %710 = vrot.lane.b32.xlu1 %v1815_v43, %s1507_s13  ;;  %694 = vrot.lane.b32.xlu0 %v1818_v44, %s1507_s13 }
  0xa0   : > { %v1838_v59 = vpop.permute.xlu1 %560  ;;  %v1840_v60 = vpop.permute.xlu0 %544 }
  0xa2   : > { %756 = vrot.lane.b32.xlu1 %v378_v57, %s1508_s14  ;;  %740 = vrot.lane.b32.xlu0 %v358_v58, %s1508_s14 }
  0xa4   : > { %v1846_v63 = vpop.permute.xlu1 %562  ;;  %v1848_v1 = vpop.permute.xlu0 %546 }
  0xa6   : > { %570 = vrot.lane.b32.xlu1 %v1815_v43, %s1504_s7  ;;  %554 = vrot.lane.b32.xlu0 %v1818_v44, %s1504_s7  ;;  %v1936_v43 = vld [vmem:[%s1914_s25 + $0x8] sm:$0xff] }
  0xa7   : > { %v426_v46 = vrot.slane %v1936_v43, 1 }
  0xa8   : > { %v1854_v5 = vpop.permute.xlu1 %608  ;;  %v1856_v7 = vpop.permute.xlu0 %592 }
  0xaa   : > { %616 = vrot.lane.b32.xlu1 %v378_v57, %s1505_s8  ;;  %600 = vrot.lane.b32.xlu0 %v358_v58, %s1505_s8 }
  0xac   : > { %v469_v15 = vpop.permute.xlu1 %468  ;;  %v453_v18 = vpop.permute.xlu0 %452 }
  0xad   : > { %v843_v35 = vsel %vm832_vm3, %v1633_v26, %v469_v15  ;;  %v835_v33 = vsel %vm832_vm3, %v1636_v27, %v453_v18 }
  0xae   : > { %758 = vrot.lane.b32.xlu1 %v380_v8, %s1508_s14  ;;  %742 = vrot.lane.b32.xlu0 %v360_v9, %s1508_s14 }
  0xb0   : > { %v1870_v22 = vpop.permute.xlu1 %610  ;;  %v1872_v23 = vpop.permute.xlu0 %594 }
  0xb2   : > { %804 = vrot.lane.b32.xlu1 %v419_v19, %s1509_s10  ;;  %788 = vrot.lane.b32.xlu0 %v399_v21, %s1509_s10 }
  0xb4   : > { %v1876_v25 = vpop.permute.xlu1 %656  ;;  %v1878_v30 = vpop.permute.xlu0 %640 }
  0xb6   : > { %476 = vrot.lane.b32.xlu1 %v378_v57, %s1502_s5  ;;  %460 = vrot.lane.b32.xlu0 %v358_v58, %s1502_s5  ;;  %v421_v57 = vsel %vm381_vm1, %v418_v12, %v420_v45  ;;  %v401_v58 = vsel %vm381_vm1, %v398_v14, %v400_v47 }
  0xb8   : > { %v1882_v31 = vpop.permute.xlu1 %470  ;;  %v1884_v32 = vpop.permute.xlu0 %454 }
  0xba   : > { %618 = vrot.lane.b32.xlu1 %v380_v8, %s1505_s8  ;;  %602 = vrot.lane.b32.xlu0 %v360_v9, %s1505_s8 }
  0xbc   : > { %v517_v48 = vpop.permute.xlu1 %516  ;;  %v501_v49 = vpop.permute.xlu0 %500 }
  0xbe   : > { %664 = vrot.lane.b32.xlu1 %v419_v19, %s1506_s9  ;;  %648 = vrot.lane.b32.xlu0 %v399_v21, %s1506_s9 }
  0xc0   : > { %v1892_v3 = vpop.permute.xlu1 %658  ;;  %v1894_v4 = vpop.permute.xlu0 %642 }
  0xc2   : > { %806 = vrot.lane.b32.xlu1 %v421_v57, %s1509_s10  ;;  %790 = vrot.lane.b32.xlu0 %v401_v58, %s1509_s10 }
  0xc4   : > { %v1898_v61 = vpop.permute.xlu1 %704  ;;  %v1900_v62 = vpop.permute.xlu0 %688 }
  0xc6   : > { %478 = vrot.lane.b32.xlu1 %v380_v8, %s1502_s5  ;;  %462 = vrot.lane.b32.xlu0 %v360_v9, %s1502_s5  ;;  %v1919_v8 = vld [vmem:[%s1914_s25] sm:$0xff]  ;;  %s1317_s5 = sshll.u32 %s1484_s15, 4 }
  0xc7   : > { %v425_v50 = vrot.slane %v1919_v8, 1  ;;  %p279_p8 = scmp.lt.s32.totalorder %s1317_s5, 31 }
  0xc8   : > { %v1904_v11 = vpop.permute.xlu1 %518  ;;  %v1906_v12 = vpop.permute.xlu0 %502 }
  0xc9   : > { %s2322_s5 = smov (!%p279_p8, %s1317_s5), 31 }
  0xca   : > { %524 = vrot.lane.b32.xlu1 %v419_v19, %s1503_s6  ;;  %508 = vrot.lane.b32.xlu0 %v399_v21, %s1503_s6 }
  0xcc   : > { %v565_v13 = vpop.permute.xlu1 %564  ;;  %v549_v14 = vpop.permute.xlu0 %548 }
  0xce   : > { %666 = vrot.lane.b32.xlu1 %v421_v57, %s1506_s9  ;;  %650 = vrot.lane.b32.xlu0 %v401_v58, %s1506_s9 }
  0xd0   : > { %v1921_v9 = vpop.permute.xlu1 %706  ;;  %v1923_v19 = vpop.permute.xlu0 %690 }
  0xd2   : > { %712 = vrot.lane.b32.xlu1 %v1919_v8, %s1507_s13  ;;  %696 = vrot.lane.b32.xlu0 %v1597_v10, %s1507_s13 }
  0xd4   : > { %v753_v21 = vpop.permute.xlu1 %752  ;;  %v737_v45 = vpop.permute.xlu0 %736 }
  0xd6   : > { %526 = vrot.lane.b32.xlu1 %v421_v57, %s1503_s6  ;;  %510 = vrot.lane.b32.xlu0 %v401_v58, %s1503_s6  ;;  %v860_v57 = vsel %vm849_vm4, %v843_v35, %v517_v48  ;;  %v852_v58 = vsel %vm849_vm4, %v835_v33, %v501_v49  ;;  %v833_v33 = vsel %vm832_vm3, %v1587_v2, %v1798_v37  ;;  %s1318_s6 = sshll.u32 %s2318_s16, 5 }
  0xd7   : > { %v877_v15 = vsel %vm866_vm5, %v860_v57, %v565_v13  ;;  %v869_v42 = vsel %vm866_vm5, %v852_v58, %v549_v14  ;;  %v841_v35 = vsel %vm832_vm3, %v1597_v10, %v1806_v39  ;;  %v427_v49 = vsel %vm340_vm0, %v425_v50, %v426_v46 }
  0xd8   : > { %v1931_v47 = vpop.permute.xlu1 %566  ;;  %v1933_v44 = vpop.permute.xlu0 %550  ;;  %v858_v48 = vsel %vm849_vm4, %v841_v35, %v1810_v40  ;;  %v431_v35 = vrot.slane %v1936_v43, 2 }
  0xd9   : > { %v875_v2 = vsel %vm866_vm5, %v858_v48, %v1838_v59 }
  0xda   : > { %572 = vrot.lane.b32.xlu1 %v1919_v8, %s1504_s7  ;;  %556 = vrot.lane.b32.xlu0 %v1597_v10, %s1504_s7  ;;  %v892_v13 = vsel %vm883_vm6, %v875_v2, %v1854_v5 }
  0xdb   : > { %v909_v50 = vsel %vm900_vm7, %v892_v13, %v1876_v25 }
  0xdc   : > { %v613_v27 = vpop.permute.xlu1 %612  ;;  %v597_v18 = vpop.permute.xlu0 %596  ;;  %v926_v59 = vsel %vm917_vm8, %v909_v50, %v1898_v61 }
  0xdd   : > { %v1953_v34 = vsel %vm883_vm6, %v877_v15, %v613_v27  ;;  %v1956_v55 = vsel %vm883_vm6, %v869_v42, %v597_v18  ;;  %v850_v42 = vsel %vm849_vm4, %v833_v33, %v1812_v41  ;;  %v943_v5 = vsel %vm934_vm9, %v926_v59, %v753_v21 }
  0xde   : > { %714 = vrot.lane.b32.xlu1 %v1936_v43, %s1507_s13  ;;  %698 = vrot.lane.b32.xlu0 %v1592_v6, %s1507_s13  ;;  %v867_v10 = vsel %vm866_vm5, %v850_v42, %v1840_v60  ;;  %v836_v15 = vsel %vm832_vm3, %v1642_v29, %v1884_v32  ;;  %v430_v27 = vrot.slane %v1919_v8, 2 }
  0xdf   : > { %v884_v40 = vsel %vm883_vm6, %v867_v10, %v1856_v7  ;;  %v853_v33 = vsel %vm849_vm4, %v836_v15, %v1906_v12 }
  0xe0   : > { %v755_v37 = vpop.permute.xlu1 %754  ;;  %v739_v39 = vpop.permute.xlu0 %738  ;;  %v901_v41 = vsel %vm900_vm7, %v884_v40, %v1878_v30  ;;  %v312_v30 = vld [vmem:[%s1914_s25 + $0x10] sm:$0x3]  ;;  %v870_v32 = vsel %vm866_vm5, %v853_v33, %v1933_v44 }
  0xe1   : > { %v918_v60 = vsel %vm917_vm8, %v901_v41, %v1900_v62  ;;  %v428_v61 = vrot.slane %v312_v30, 1 }
  0xe2   : > { %760 = vrot.lane.b32.xlu1 %v427_v49, %s1508_s14  ;;  %744 = vrot.lane.b32.xlu0 %v1610_v17, %s1508_s14  ;;  %v935_v7 = vsel %vm934_vm9, %v918_v60, %v737_v45  ;;  %v844_v45 = vsel %vm832_vm3, %v1639_v28, %v1882_v31 }
  0xe3   : > { %v861_v18 = vsel %vm849_vm4, %v844_v45, %v1904_v11  ;;  %v429_v31 = vsel %vm340_vm0, %v426_v46, %v428_v61  ;;  %v842_v46 = vsel %vm832_vm3, %v1592_v6, %v1804_v38 }
  0xe4   : > { %v801_v25 = vpop.permute.xlu1 %800  ;;  %v785_v14 = vpop.permute.xlu0 %784  ;;  %v878_v29 = vsel %vm866_vm5, %v861_v18, %v1931_v47  ;;  %v432_v47 = vsel %vm381_vm1, %v430_v27, %v431_v35 }
  0xe5   : > { %v960_v57 = vsel %vm951_vm10, %v943_v5, %v801_v25  ;;  %v952_v58 = vsel %vm951_vm10, %v935_v7, %v785_v14  ;;  %v314_v7 = vld [vmem:[%s1914_s25 + $0x20] sm:$0xff] }
  0xe6   : > { %574 = vrot.lane.b32.xlu1 %v1936_v43, %s1504_s7  ;;  %1385 = vmatprep.mubr.msk.f32.mxu1 %vm980_vm11, %v960_v57  ;;  %v859_v43 = vsel %vm849_vm4, %v842_v46, %v1828_v51  ;;  %v439_v14 = vrot.slane %v314_v7, 1  ;;  %v2298_v57 = vld [vmem:[#allocation6_spill] sm:$0xff] }
  0xe7   : > { %558 = vrot.lane.b32.xlu0 %v1592_v6, %s1504_s7  ;;  %1373 = vmatprep.mubr.msk.f32.mxu0 %vm980_vm11, %v952_v58  ;;  %s282_s7 = sadd.s32 %s1318_s6, %s2322_s5 }
  0xe8   : > { %v473_v62 = vpop.permute.xlu1 %472  ;;  %v457_v21 = vpop.permute.xlu0 %456 }
  0xe9   : > { %v845_v13 = vsel %vm832_vm3, %v1705_v52, %v473_v62  ;;  %v313_v52 = vld [vmem:[%s1914_s25 + $0x18] sm:$0xff] }
  0xea   : > { %620 = vrot.lane.b32.xlu1 %v427_v49, %s1505_s8  ;;  %v438_v25 = vrot.slane %v313_v52, 1 }
  0xeb   : > { %604 = vrot.lane.b32.xlu0 %v1610_v17, %s1505_s8  ;;  %v834_v17 = vsel %vm832_vm3, %v1583_v0, %v1796_v36  ;;  %v876_v0 = vsel %vm866_vm5, %v859_v43, %v1846_v63 }
  0xec   : > { %v615_v8 = vpop.permute.xlu1 %614  ;;  %v599_v48 = vpop.permute.xlu0 %598  ;;  %v851_v44 = vsel %vm849_vm4, %v834_v17, %v1830_v56  ;;  %v893_v51 = vsel %vm883_vm6, %v876_v0, %v1870_v22 }
  0xed   : > { %v2024_v11 = vsel %vm883_vm6, %v878_v29, %v615_v8  ;;  %v2027_v12 = vsel %vm883_vm6, %v870_v32, %v599_v48  ;;  %v868_v36 = vsel %vm866_vm5, %v851_v44, %v1848_v1  ;;  %v910_v42 = vsel %vm900_vm7, %v893_v51, %v1892_v3  ;;  %v2299_v29 = vld [vmem:[#allocation2_spill] sm:$0xff]  ;;  %v2300_v48 = vld [vmem:[#allocation3_spill] sm:$0xff] }
  0xee   : > { %762 = vrot.lane.b32.xlu1 %v429_v31, %s1508_s14  ;;  %v885_v56 = vsel %vm883_vm6, %v868_v36, %v1872_v23  ;;  %v927_v63 = vsel %vm917_vm8, %v910_v42, %v1921_v9  ;;  %v433_v9 = vrot.slane %v312_v30, 2 }
  0xef   : > { %746 = vrot.lane.b32.xlu0 %v1607_v16, %s1508_s14  ;;  %v902_v49 = vsel %vm900_vm7, %v885_v56, %v1894_v4  ;;  %v944_v22 = vsel %vm934_vm9, %v927_v63, %v755_v37 }
  0xf0   : > { %v2047_v6 = vpop.permute.xlu1 %660  ;;  %v2049_v38 = vpop.permute.xlu0 %644  ;;  %v919_v1 = vsel %vm917_vm8, %v902_v49, %v1923_v19  ;;  %v2302_v49 = vld [vmem:[#allocation5_spill] sm:$0xff] }
  0xf1   : > { %v936_v23 = vsel %vm934_vm9, %v919_v1, %v739_v39  ;;  %v434_v39 = vsel %vm381_vm1, %v431_v35, %v433_v9  ;;  %v443_v35 = vrot.slane %v313_v52, 2 }
  0xf2   : > { %808 = vrot.lane.b32.xlu1 %v432_v47, %s1509_s10 }
  0xf3   : > { %792 = vrot.lane.b32.xlu0 %v1619_v20, %s1509_s10 }
  0xf4   : > { %v803_v2 = vpop.permute.xlu1 %802  ;;  %v787_v3 = vpop.permute.xlu0 %786 }
  0xf5   : > { %v961_v10 = vsel %vm951_vm10, %v944_v22, %v803_v2  ;;  %v953_v4 = vsel %vm951_vm10, %v936_v23, %v787_v3 }
  0xf6   : > { %622 = vrot.lane.b32.xlu1 %v429_v31, %s1505_s8  ;;  %1386 = vmatmul.mubr.msk.f32.vlgmr.msra.gmra.mrb[0].mxu1 %vm980_vm11, %v961_v10  ;;  %v444_v31 = vrot.slane %v314_v7, 2  ;;  %v911_v10 = vsel %vm900_vm7, %v1953_v34, %v2047_v6 }
  0xf7   : > { %606 = vrot.lane.b32.xlu0 %v1607_v16, %s1505_s8  ;;  %1374 = vmatmul.mubr.msk.f32.vlgmr.msra.gmra.mrb[0].mxu0 %vm980_vm11, %v953_v4  ;;  %v837_v16 = vsel %vm832_vm3, %v1708_v53, %v457_v21  ;;  %v903_v4 = vsel %vm900_vm7, %v1956_v55, %v2049_v38  ;;  %s1319_s8 = sshll.u32 %s282_s7, 3 }
  0xf8   : > { %v475_v19 = vpop.permute.xlu1 %474  ;;  %v459_v37 = vpop.permute.xlu0 %458  ;;  %v445_v17 = vsel %vm381_vm1, %v443_v35, %v444_v31  ;;  %s2242_s26 = scalar_lea.vmem %s2279_s4, %s1319_s8 }
  0xf9   : > { %v846_v30 = vsel %vm832_vm3, %v1718_v54, %v475_v19  ;;  %v838_v58 = vsel %vm832_vm3, %v2298_v57, %v459_v37 }
  0xfa   : > { %668 = vrot.lane.b32.xlu1 %v432_v47, %s1506_s9  ;;  %v2301_v47 = vld [vmem:[#allocation4_spill] sm:$0xff] }
  0xfb   : > { %652 = vrot.lane.b32.xlu0 %v1619_v20, %s1506_s9 }
  0xfc   : > { %v521_v40 = vpop.permute.xlu1 %520  ;;  %v505_v50 = vpop.permute.xlu0 %504 }
  0xfd   : > { %v862_v41 = vsel %vm849_vm4, %v845_v13, %v521_v40  ;;  %v854_v59 = vsel %vm849_vm4, %v837_v16, %v505_v50 }
  0xfe   : > { %810 = vrot.lane.b32.xlu1 %v434_v39, %s1509_s10 }
  0xff   : > { %794 = vrot.lane.b32.xlu0 %v1626_v24, %s1509_s10 }
 0x100   : > { %v2088_v20 = vpop.permute.xlu1 %662  ;;  %v2090_v60 = vpop.permute.xlu0 %646 }
 0x102   : > { %670 = vrot.lane.b32.xlu1 %v434_v39, %s1506_s9 }
 0x103   : > { %654 = vrot.lane.b32.xlu0 %v1626_v24, %s1506_s9  ;;  %v315_v24 = vld [vmem:[%s1914_s25 + $0x28] sm:$0x3] }
 0x104   : > { %v709_v53 = vpop.permute.xlu1 %708  ;;  %v693_v5 = vpop.permute.xlu0 %692  ;;  %v441_v15 = vrot.slane %v315_v24, 1  ;;  %v446_v46 = vrot.slane %v315_v24, 2 }
 0x105   : > { %v928_v9 = vsel %vm917_vm8, %v911_v10, %v709_v53  ;;  %v920_v19 = vsel %vm917_vm8, %v903_v4, %v693_v5  ;;  %v912_v5 = vsel %vm900_vm7, %v2024_v11, %v2088_v20  ;;  %v2303_v20 = vld [vmem:[#allocation7_spill] sm:$0xff] }
 0x106   : > { %716 = vrot.lane.b32.xlu1 %v313_v52, %s1507_s13  ;;  %v442_v32 = vsel %vm340_vm0, %v439_v14, %v441_v15  ;;  %v447_v0 = vsel %vm381_vm1, %v444_v31, %v446_v46 }
 0x107   : > { %700 = vrot.lane.b32.xlu0 %v1633_v26, %s1507_s13  ;;  %v440_v26 = vsel %vm340_vm0, %v438_v25, %v439_v14 }
 0x108   : > { %v523_v61 = vpop.permute.xlu1 %522  ;;  %v507_v62 = vpop.permute.xlu0 %506 }
 0x109   : > { %v863_v21 = vsel %vm849_vm4, %v846_v30, %v523_v61  ;;  %v855_v45 = vsel %vm849_vm4, %v838_v58, %v507_v62 }
 0x10a   : > { %718 = vrot.lane.b32.xlu1 %v314_v7, %s1507_s13  ;;  %v904_v7 = vsel %vm900_vm7, %v2027_v12, %v2090_v60 }
 0x10b   : > { %702 = vrot.lane.b32.xlu0 %v1639_v28, %s1507_s13 }
 0x10c   : > { %v569_v27 = vpop.permute.xlu1 %568  ;;  %v553_v54 = vpop.permute.xlu0 %552 }
 0x10d   : > { %v879_v18 = vsel %vm866_vm5, %v862_v41, %v569_v27  ;;  %v871_v33 = vsel %vm866_vm5, %v854_v59, %v553_v54 }
 0x10e   : > { %764 = vrot.lane.b32.xlu1 %v440_v26, %s1508_s14 }
 0x10f   : > { %748 = vrot.lane.b32.xlu0 %v2299_v29, %s1508_s14 }
 0x110   : > { %v711_v8 = vpop.permute.xlu1 %710  ;;  %v695_v28 = vpop.permute.xlu0 %694 }
 0x111   : > { %v929_v25 = vsel %vm917_vm8, %v912_v5, %v711_v8  ;;  %v921_v14 = vsel %vm917_vm8, %v904_v7, %v695_v28 }
 0x112   : > { %766 = vrot.lane.b32.xlu1 %v442_v32, %s1508_s14 }
 0x113   : > { %750 = vrot.lane.b32.xlu0 %v2300_v48, %s1508_s14 }
 0x114   : > { %v757_v43 = vpop.permute.xlu1 %756  ;;  %v741_v44 = vpop.permute.xlu0 %740 }
 0x115   : > { %v945_v37 = vsel %vm934_vm9, %v928_v9, %v757_v43  ;;  %v937_v39 = vsel %vm934_vm9, %v920_v19, %v741_v44 }
 0x116   : > { %812 = vrot.lane.b32.xlu1 %v445_v17, %s1509_s10 }
 0x117   : > { %796 = vrot.lane.b32.xlu0 %v2301_v47, %s1509_s10 }
 0x118   : > { %v571_v36 = vpop.permute.xlu1 %570  ;;  %v555_v51 = vpop.permute.xlu0 %554 }
 0x119   : > { %v880_v56 = vsel %vm866_vm5, %v863_v21, %v571_v36  ;;  %v872_v42 = vsel %vm866_vm5, %v855_v45, %v555_v51  ;;  %v2304_v21 = vld [vmem:[#allocation8_spill] sm:$0xff] }
 0x11a   : > { %814 = vrot.lane.b32.xlu1 %v447_v0, %s1509_s10 }
 0x11b   : > { %798 = vrot.lane.b32.xlu0 %v2302_v49, %s1509_s10 }
 0x11c   : > { %v617_v63 = vpop.permute.xlu1 %616  ;;  %v601_v1 = vpop.permute.xlu0 %600 }
 0x11d   : > { %v2131_v22 = vsel %vm883_vm6, %v879_v18, %v617_v63  ;;  %v2134_v23 = vsel %vm883_vm6, %v871_v33, %v601_v1 }
 0x120   : > { %v759_v2 = vpop.permute.xlu1 %758  ;;  %v743_v3 = vpop.permute.xlu0 %742 }
 0x121   : > { %v946_v30 = vsel %vm934_vm9, %v929_v25, %v759_v2  ;;  %v938_v57 = vsel %vm934_vm9, %v921_v14, %v743_v3 }
 0x124   : > { %v805_v13 = vpop.permute.xlu1 %804  ;;  %v789_v16 = vpop.permute.xlu0 %788 }
 0x125   : > { %v962_v40 = vsel %vm951_vm10, %v945_v37, %v805_v13  ;;  %v954_v50 = vsel %vm951_vm10, %v937_v39, %v789_v16 }
 0x126   : > { %1376 = vmatprep.mubr.msk.f32.mxu0 %vm980_vm11, %v954_v50  ;;  %1388 = vmatprep.mubr.msk.f32.mxu1 %vm980_vm11, %v962_v40 }
 0x128   : > { %v477_v34 = vpop.permute.xlu1 %476  ;;  %v461_v55 = vpop.permute.xlu0 %460 }
 0x129   : > { %v847_v60 = vsel %vm832_vm3, %v2303_v20, %v477_v34  ;;  %v839_v45 = vsel %vm832_vm3, %v2304_v21, %v461_v55 }
 0x12c   : > { %v619_v6 = vpop.permute.xlu1 %618  ;;  %v603_v38 = vpop.permute.xlu0 %602 }
 0x12d   : > { %v897_v41 = vsel %vm883_vm6, %v880_v56, %v619_v6  ;;  %v889_v59 = vsel %vm883_vm6, %v872_v42, %v603_v38 }
 0x130   : > { %v665_v52 = vpop.permute.xlu1 %664  ;;  %v649_v53 = vpop.permute.xlu0 %648 }
 0x131   : > { %v913_v42 = vsel %vm900_vm7, %v2131_v22, %v665_v52  ;;  %v905_v49 = vsel %vm900_vm7, %v2134_v23, %v649_v53 }
 0x134   : > { %v807_v58 = vpop.permute.xlu1 %806  ;;  %v791_v61 = vpop.permute.xlu0 %790 }
 0x135   : > { %v963_v62 = vsel %vm951_vm10, %v946_v30, %v807_v58  ;;  %v955_v24 = vsel %vm951_vm10, %v938_v57, %v791_v61 }
 0x136   : > { %1377 = vmatmul.mubr.msk.f32.gmra.mrb[2].mxu0 %vm980_vm11, %v955_v24  ;;  %1389 = vmatmul.mubr.msk.f32.gmra.mrb[2].mxu1 %vm980_vm11, %v963_v62 }
 0x138   : > { %v2166_v11 = vpop.permute.xlu1 %478  ;;  %v2168_v12 = vpop.permute.xlu0 %462 }
 0x13c   : > { %v525_v26 = vpop.permute.xlu1 %524  ;;  %v509_v15 = vpop.permute.xlu0 %508 }
 0x13d   : > { %v864_v27 = vsel %vm849_vm4, %v847_v60, %v525_v26  ;;  %v856_v54 = vsel %vm849_vm4, %v839_v45, %v509_v15  ;;  %v2305_v60 = vld [vmem:[#allocation9_spill] sm:$0xff]  ;;  %v2306_v15 = vld [vmem:[#allocation10_spill] sm:$0xff] }
 0x13e   : > { %v848_v21 = vsel %vm832_vm3, %v2305_v60, %v2166_v11 }
 0x140   : > { %v667_v18 = vpop.permute.xlu1 %666  ;;  %v651_v33 = vpop.permute.xlu0 %650 }
 0x141   : > { %v914_v13 = vsel %vm900_vm7, %v897_v41, %v667_v18  ;;  %v906_v16 = vsel %vm900_vm7, %v889_v59, %v651_v33  ;;  %v840_v18 = vsel %vm832_vm3, %v2306_v15, %v2168_v12 }
 0x144   : > { %v713_v35 = vpop.permute.xlu1 %712  ;;  %v697_v31 = vpop.permute.xlu0 %696 }
 0x145   : > { %v930_v63 = vsel %vm917_vm8, %v913_v42, %v713_v35  ;;  %v922_v1 = vsel %vm917_vm8, %v905_v49, %v697_v31 }
 0x148   : > { %v527_v29 = vpop.permute.xlu1 %526  ;;  %v511_v32 = vpop.permute.xlu0 %510 }
 0x149   : > { %v857_v35 = vsel %vm849_vm4, %v840_v18, %v511_v32 }
 0x14c   : > { %v573_v8 = vpop.permute.xlu1 %572  ;;  %v557_v28 = vpop.permute.xlu0 %556 }
 0x14d   : > { %v881_v58 = vsel %vm866_vm5, %v864_v27, %v573_v8  ;;  %v873_v62 = vsel %vm866_vm5, %v856_v54, %v557_v28  ;;  %v865_v27 = vsel %vm849_vm4, %v848_v21, %v527_v29 }
 0x150   : > { %v715_v48 = vpop.permute.xlu1 %714  ;;  %v699_v17 = vpop.permute.xlu0 %698 }
 0x151   : > { %v931_v40 = vsel %vm917_vm8, %v914_v13, %v715_v48  ;;  %v923_v50 = vsel %vm917_vm8, %v906_v16, %v699_v17 }
 0x154   : > { %v761_v46 = vpop.permute.xlu1 %760  ;;  %v745_v43 = vpop.permute.xlu0 %744 }
 0x155   : > { %v947_v2 = vsel %vm934_vm9, %v930_v63, %v761_v46  ;;  %v939_v10 = vsel %vm934_vm9, %v922_v1, %v745_v43 }
 0x158   : > { %v575_v44 = vpop.permute.xlu1 %574 }
 0x159   : > { %v559_v47 = vpop.permute.xlu0 %558  ;;  %v882_v31 = vsel %vm866_vm5, %v865_v27, %v575_v44 }
 0x15a   : > { %v874_v48 = vsel %vm866_vm5, %v857_v35, %v559_v47 }
 0x15c   : > { %v621_v0 = vpop.permute.xlu1 %620 }
 0x15d   : > { %v605_v36 = vpop.permute.xlu0 %604  ;;  %v898_v24 = vsel %vm883_vm6, %v881_v58, %v621_v0 }
 0x15e   : > { %v890_v45 = vsel %vm883_vm6, %v873_v62, %v605_v36 }
 0x160   : > { %v763_v51 = vpop.permute.xlu1 %762 }
 0x161   : > { %v747_v56 = vpop.permute.xlu0 %746  ;;  %v948_v34 = vsel %vm934_vm9, %v931_v40, %v763_v51 }
 0x162   : > { %v940_v6 = vsel %vm934_vm9, %v923_v50, %v747_v56 }
 0x164   : > { %v809_v3 = vpop.permute.xlu1 %808 }
 0x165   : > { %v964_v4 = vsel %vm951_vm10, %v947_v2, %v809_v3  ;;  %v793_v9 = vpop.permute.xlu0 %792  ;;  %v1320_v2 = vld [vmem:[%s2278_s3] ss:$0 sm:$0xff] }
 0x166   : > { %v956_v19 = vsel %vm951_vm10, %v939_v10, %v793_v9  ;;  %1391 = vmatprep.mubr.msk.f32.mxu1 %vm980_vm11, %v964_v4 }
 0x167   : > { %1379 = vmatprep.mubr.msk.f32.mxu0 %vm980_vm11, %v956_v19 }
 0x168   : > { %v623_v22 = vpop.permute.xlu1 %622 }
 0x169   : > { %v607_v23 = vpop.permute.xlu0 %606  ;;  %v899_v17 = vsel %vm883_vm6, %v882_v31, %v623_v22 }
 0x16a   : > { %v891_v43 = vsel %vm883_vm6, %v874_v48, %v607_v23 }
 0x16c   : > { %v669_v37 = vpop.permute.xlu1 %668 }
 0x16d   : > { %v653_v39 = vpop.permute.xlu0 %652  ;;  %v915_v26 = vsel %vm900_vm7, %v898_v24, %v669_v37 }
 0x16e   : > { %v907_v33 = vsel %vm900_vm7, %v890_v45, %v653_v39 }
 0x170   : > { %v811_v55 = vpop.permute.xlu1 %810 }
 0x171   : > { %v965_v38 = vsel %vm951_vm10, %v948_v34, %v811_v55  ;;  %v795_v52 = vpop.permute.xlu0 %794 }
 0x172   : > { %v957_v53 = vsel %vm951_vm10, %v940_v6, %v795_v52  ;;  %1392 = vmatmul.mubr.msk.f32.gmra.mrb[4].mxu1 %vm980_vm11, %v965_v38 }
 0x173   : > { %1380 = vmatmul.mubr.msk.f32.gmra.mrb[4].mxu0 %vm980_vm11, %v957_v53 }
 0x174   : > { %v671_v41 = vpop.permute.xlu1 %670 }
 0x175   : > { %v655_v59 = vpop.permute.xlu0 %654  ;;  %v916_v32 = vsel %vm900_vm7, %v899_v17, %v671_v41 }
 0x176   : > { %v908_v0 = vsel %vm900_vm7, %v891_v43, %v655_v59 }
 0x178   : > { %v717_v5 = vpop.permute.xlu1 %716 }
 0x179   : > { %v701_v7 = vpop.permute.xlu0 %700  ;;  %v932_v54 = vsel %vm917_vm8, %v915_v26, %v717_v5 }
 0x17a   : > { %v924_v11 = vsel %vm917_vm8, %v907_v33, %v701_v7 }
 0x17c   : > { %v719_v25 = vpop.permute.xlu1 %718 }
 0x17d   : > { %v703_v14 = vpop.permute.xlu0 %702  ;;  %v933_v47 = vsel %vm917_vm8, %v916_v32, %v719_v25 }
 0x17e   : > { %v925_v36 = vsel %vm917_vm8, %v908_v0, %v703_v14 }
 0x180   : > { %v765_v30 = vpop.permute.xlu1 %764 }
 0x181   : > { %v749_v57 = vpop.permute.xlu0 %748  ;;  %v949_v8 = vsel %vm934_vm9, %v932_v54, %v765_v30 }
 0x182   : > { %v941_v12 = vsel %vm934_vm9, %v924_v11, %v749_v57 }
 0x184   : > { %v767_v61 = vpop.permute.xlu1 %766 }
 0x185   : > { %v751_v20 = vpop.permute.xlu0 %750  ;;  %v950_v51 = vsel %vm934_vm9, %v933_v47, %v767_v61 }
 0x186   : > { %v942_v42 = vsel %vm934_vm9, %v925_v36, %v751_v20 }
 0x188   : > { %v813_v28 = vpop.permute.xlu1 %812 }
 0x189   : > { %v966_v29 = vsel %vm951_vm10, %v949_v8, %v813_v28  ;;  %v797_v46 = vpop.permute.xlu0 %796 }
 0x18a   : > { %v958_v44 = vsel %vm951_vm10, %v941_v12, %v797_v46  ;;  %1394 = vmatprep.mubr.msk.f32.mxu1 %vm980_vm11, %v966_v29 }
 0x18b   : > { %1382 = vmatprep.mubr.msk.f32.mxu0 %vm980_vm11, %v958_v44 }
 0x18c   : > { %v815_v56 = vpop.permute.xlu1 %814 }
 0x18d   : > { %v967_v49 = vsel %vm951_vm10, %v950_v51, %v815_v56  ;;  %v799_v63 = vpop.permute.xlu0 %798 }
 0x18e   : > { %v959_v1 = vsel %vm951_vm10, %v942_v42, %v799_v63  ;;  %1395 = vmatmul.mubr.msk.f32.gmra.mrb[6].mxu1 %vm980_vm11, %v967_v49 }
 0x18f   : > { %1383 = vmatmul.mubr.msk.f32.gmra.mrb[6].mxu0 %vm980_vm11, %v959_v1 }
 0x1c9   : > { %v1387_v3 = vpop.f32.mrb[0].mxu1 }
 0x1ca   : > { %v1375_v10 = vpop.f32.mrb[0].mxu0  ;;  %v1145_v4 = vadd.f32 %v1387_v3, %v1320_v2  ;;  %v1139_v9 = vpop.f32.mrb[1].mxu1 }
 0x1cb   : > { %v1105_v19 = vadd.f32 %v1375_v10, %v1320_v2  ;;  %v1099_v22 = vpop.f32.mrb[1].mxu0  ;;  %v1140_v23 = vadd.f32 %v1320_v2, %v1139_v9 }
 0x1cc   : > { %1187 = vst [vmem:[%s2242_s26 + $0x48] sm:$0xff] %v1145_v4  ;;  %v1100_v37 = vadd.f32 %v1320_v2, %v1099_v22 }
 0x1cd   : > { %1179 = vst [vmem:[%s2242_s26 + $0x8] sm:$0xff] %v1105_v19  ;;  %1186 = vst [vmem:[%s2242_s26 + $0x40] sm:$0xff] %v1140_v23 }
 0x1ce   : > { %1178 = vst [vmem:[%s2242_s26] sm:$0xff] %v1100_v37 }
 0x209   : > { %v1378_v39 = vpop.f32.mrb[2].mxu0  ;;  %v1390_v13 = vpop.f32.mrb[2].mxu1 }
 0x20a   : > { %v1115_v16 = vadd.f32 %v1378_v39, %v1320_v2  ;;  %v1155_v40 = vadd.f32 %v1390_v13, %v1320_v2  ;;  %v1109_v50 = vpop.f32.mrb[3].mxu0  ;;  %v1149_v34 = vpop.f32.mrb[3].mxu1 }
 0x20b   : > { %v1110_v55 = vadd.f32 %v1320_v2, %v1109_v50  ;;  %v1150_v6 = vadd.f32 %v1320_v2, %v1149_v34 }
 0x20c   : > { %1181 = vst [vmem:[%s2242_s26 + $0x18] sm:$0xff] %v1115_v16  ;;  %1189 = vst [vmem:[%s2242_s26 + $0x58] sm:$0xff] %v1155_v40 }
 0x20d   : > { %1180 = vst [vmem:[%s2242_s26 + $0x10] sm:$0xff] %v1110_v55  ;;  %1188 = vst [vmem:[%s2242_s26 + $0x50] sm:$0xff] %v1150_v6 }
 0x245   : > { %v1393_v38 = vpop.f32.mrb[4].mxu1 }
 0x246   : > { %v1381_v52 = vpop.f32.mrb[4].mxu0  ;;  %v1165_v53 = vadd.f32 %v1393_v38, %v1320_v2  ;;  %v1159_v41 = vpop.f32.mrb[5].mxu1 }
 0x247   : > { %v1125_v59 = vadd.f32 %v1381_v52, %v1320_v2  ;;  %v1119_v5 = vpop.f32.mrb[5].mxu0  ;;  %v1160_v7 = vadd.f32 %v1320_v2, %v1159_v41 }
 0x248   : > { %1191 = vst [vmem:[%s2242_s26 + $0x68] sm:$0xff] %v1165_v53  ;;  %v1120_v25 = vadd.f32 %v1320_v2, %v1119_v5 }
 0x249   : > { %1183 = vst [vmem:[%s2242_s26 + $0x28] sm:$0xff] %v1125_v59  ;;  %1190 = vst [vmem:[%s2242_s26 + $0x60] sm:$0xff] %v1160_v7 }
 0x24a   : > { %1182 = vst [vmem:[%s2242_s26 + $0x20] sm:$0xff] %v1120_v25 }
 0x261   : > { %v1396_v14 = vpop.f32.mrb[6].mxu1 }
 0x262   : > { %v1384_v30 = vpop.f32.mrb[6].mxu0  ;;  %v1175_v57 = vadd.f32 %v1396_v14, %v1320_v2  ;;  %v1169_v58 = vpop.f32.mrb[7].mxu1 }
 0x263   : > { %v1135_v61 = vadd.f32 %v1384_v30, %v1320_v2  ;;  %v1129_v62 = vpop.f32.mrb[7].mxu0  ;;  %v1170_v24 = vadd.f32 %v1320_v2, %v1169_v58 }
 0x264   : > { %1193 = vst [vmem:[%s2242_s26 + $0x78] sm:$0xff] %v1175_v57  ;;  %v1130_v20 = vadd.f32 %v1320_v2, %v1129_v62 }
 0x265   : > { %1185 = vst [vmem:[%s2242_s26 + $0x38] sm:$0xff] %v1135_v61  ;;  %1192 = vst [vmem:[%s2242_s26 + $0x70] sm:$0xff] %v1170_v24 }
 0x266   : > { %1184 = vst [vmem:[%s2242_s26 + $0x30] sm:$0xff] %v1130_v20 }
 0x267 PF: > { %s14_s19 = sadd.s32 1, %s1500_s19   ;;  %s2307_s15 = smov %s1492_s17 }
 0x268   : > { %p11_p9 = scmp.ge.s32.totalorder %s14_s19, 6   ;;  %s2308_s16 = smov %s1496_s18 }
 0x269   : > { %s2309_s17 = smov %s2312_s20  ;;  %s2310_s18 = smov %s2316_s21 }
 0x26a   :  { %13 = sbr.rel (!%p11_p9) target bundleno = 3 (0x3), region = 69 }

// kernel: upsample_forward.1
= control target key start
LH: loop header
LB: loop body
LE: loop exit
PB: predicated region body
PF: predicated region fallthrough
CT: control target
= control target key end

     0   :  { %s2967_s15 = smov 0   ;;  %s2969_s16 = smov 0   ;;  %s3677_s0 = inlined_call_operand.vmem [shape: f32[2,24,18,4], index: 0, kind: input, shape index: {}, may-alias: {0,1}]   ;;  %s3678_s1 = inlined_call_operand.vmem [shape: f32[2,24,18,4], index: 1, kind: input, shape index: {}, may-alias: {0,1}]   ;;  %s3679_s2 = inlined_call_operand.vmem [shape: f32[36,128], index: 2, kind: input, shape index: {}]   ;;  %s3680_s3 = inlined_call_operand.vmem [shape: f32[1,128], index: 3, kind: input, shape index: {}]   ;;  %s3681_s4 = inlined_call_operand.vmem [shape: f32[2,256,128], index: 4, kind: output, shape index: {}]  }
   0x1   :  { %s2971_s17 = smov 0   ;;  %s2973_s18 = smov 0  }
   0x2   :  { %s2975_s19 = smov 0  }
   0x3 LB: > { %s23_s20 = sadd.s32 1, %s2932_s17  ;;  %s26_s21 = sadd.s32 1, %s2936_s18  ;;  %s2940_s19 = sphi %s2975_s19, %s14_s19   ;;  %s2936_s18 = sphi %s2973_s18, %s3686_s18   ;;  %s2932_s17 = sphi %s2971_s17, %s3685_s17   ;;  %s2928_s16 = sphi %s2969_s16, %s3684_s16   ;;  %s2924_s15 = sphi %s2967_s15, %s3683_s15  }
   0x4   : > { %p24_p0 = scmp.ge.s32.totalorder %s23_s20, 2  ;;  %p2176_p1 = scmp.ge.s32.totalorder %s2940_s19, 1 }
   0x5   : > { %p206_p2 = scmp.lt.s32.totalorder %s2940_s19, 5 }
   0x6   : > { %s3688_s20 = smov (%p24_p0, %s23_s20), 0  ;;  %s3690_s21 = smov (!%p24_p0, %s26_s21), %s2936_s18 }
   0x7   : > { %p207_p3 = pnand %p2176_p1, %p206_p2  ;;  %p28_p4 = scmp.ge.s32.totalorder %s3690_s21, 2 }
   0x8   : > { %v448_v0 = vld [vmem:[%s3679_s2] sm:$0xff] (!%p207_p3)  ;;  %vm488_vm0 = vcmask (!%p207_p3), 1043456   ;;  %v3005_v1 = vld [vmem:[%s3679_s2 + $0x10] sm:$0xff] (!%p207_p3)  ;;  %s3008_s26 = sshll.u32 (!%p207_p3), %s2924_s15, 3  ;;  %p253_p5 = scmp.lt.s32.totalorder (!%p207_p3), %s2928_s16, 1  ;;  %vm340_vm1 = vcmask (!%p207_p3), 1046528  }
   0x9   : > { %s3692_s21 = smov (%p28_p4, %s3690_s21), 0  ;;  %210 = sbr.rel (%p207_p3) target bundleno = 388 (0x184), region = 36 }
   0xa   : > { %v454_v2 = vrot.slane (!%p207_p3), %v448_v0, 4  ;;  %2599 = vmatprep.subr.msk.mxu0 (!%p207_p3), %vm488_vm0, %v3005_v1  ;;  %p255_p6 = scmp.lt.s32.totalorder (!%p207_p3), %s3008_s26, 23  ;;  %v1347_v3 = vrot.slane (!%p207_p3), %v3005_v1, 4  ;;  %s2341_s9 = sadd.s32 (!%p207_p3), 8, %s3008_s26  ;;  %vm455_vm2 = vcmask (!%p207_p3), 31744   ;;  %v3101_v33 = vld [vmem:[%s3679_s2 + $0x18] sm:$0xff] (!%p207_p3) }
   0xb   : > { %2600 = vmatpush3.msk.msra.mxu0 (!%p207_p3), %vm488_vm0, %v3005_v1  ;;  %p3060_p7 = scmp.lt.s32.totalorder (!%p207_p3), %s2341_s9, 23  ;;  %v3111_v35 = vld [vmem:[%s3679_s2 + $0x8] sm:$0xff] (!%p207_p3)  ;;  %vm381_vm3 = vcmask (!%p207_p3), 1045504  }
   0xc   : > { %2495 = vmatprep.subr.msk.mxu1 (!%p207_p3), %vm488_vm0, %v454_v2  ;;  %2625 = vmatprep.subr.msk.mxu0 (!%p207_p3), %vm488_vm0, %v1347_v3 }
   0xd   : > { %2496 = vmatpush3.msk.msra.mxu1 (!%p207_p3), %vm488_vm0, %v454_v2 }
   0xe   : > { %2521 = vmatprep.subr.msk.mxu1 (!%p207_p3), %vm488_vm0, %v448_v0 }
  0x10   : > { %s3694_s16 = smov (!%p253_p5, %s2928_s16), 1  ;;  %s3696_s9 = smov (!%p3060_p7, %s2341_s9), 23 }
  0x11   : > { %s256_s27 = scalar_select %p255_p6, %s3008_s26, 23 }
  0x12   : > { %s2860_s28 = smul.u32 72, %s3694_s16 }
  0x13   : > { %s2859_s29 = smul.u32 3, %s256_s27 }
  0x14   : > { %s2861_s22 = smul.u32 3, %s3696_s9 }
  0x15   : > { %s259_s30 = sadd.s32 %s2860_s28, %s2859_s29 }
  0x16   : > { %s2178_s5 = sshll.u32 %s259_s30, 3  ;;  %s3173_s23 = sadd.s32 %s2861_s22, %s2860_s28 }
  0x17   : > { %s3029_s8 = scalar_lea.vmem %s3677_s0, %s2178_s5  ;;  %s2180_s24 = sshll.u32 %s3173_s23, 3 }
  0x18   : > { %v3033_v4 = vld [vmem:[%s3029_s8] sm:$0xff]  ;;  %v3036_v5 = vld [vmem:[%s3029_s8 + $0x8] sm:$0xff]  ;;  %v3039_v6 = vld [vmem:[%s3029_s8 + $0x18] sm:$0xff]  ;;  %s3231_s27 = scalar_lea.vmem %s3678_s1, %s2180_s24  ;;  %s2181_s30 = sshll.u32 %s2924_s15, 4 }
  0x19   : > { %v341_v7 = vrot.slane %v3033_v4, 1  ;;  %v342_v8 = vrot.slane %v3036_v5, 1  ;;  %v3044_v9 = vld [vmem:[%s3029_s8 + $0x20] sm:$0xff]  ;;  %v346_v10 = vrot.slane %v3039_v6, 1  ;;  %v3048_v11 = vld [vmem:[%s3029_s8 + $0x10] sm:$0x3] }
  0x1a   : > { %v347_v12 = vrot.slane %v3044_v9, 1  ;;  %v344_v13 = vrot.slane %v3048_v11, 1  ;;  %v3053_v14 = vld [vmem:[%s3029_s8 + $0x28] sm:$0x3]  ;;  %v3056_v15 = vld [vmem:[%s3029_s8 + $0x30] sm:$0xff]  ;;  %v3067_v18 = vld [vmem:[%s3029_s8 + $0x38] sm:$0xff] }
  0x1b   : > { %v343_v16 = vsel %vm340_vm1, %v341_v7, %v342_v8  ;;  %v349_v17 = vrot.slane %v3053_v14, 1  ;;  %v351_v19 = vrot.slane %v3056_v15, 1  ;;  %v3071_v20 = vld [vmem:[%s3029_s8 + $0x40] sm:$0x3]  ;;  %v352_v23 = vrot.slane %v3067_v18, 1  ;;  %v3079_v25 = vld [vmem:[%s3029_s8 + $0x48] sm:$0xff] }
  0x1c   : > { %2497 = vmatprep.mubr.msk.f32.mxu1 %vm455_vm2, %v343_v16  ;;  %v348_v21 = vsel %vm340_vm1, %v346_v10, %v347_v12  ;;  %v345_v22 = vsel %vm340_vm1, %v342_v8, %v344_v13  ;;  %v354_v24 = vrot.slane %v3071_v20, 1  ;;  %v3082_v26 = vld [vmem:[%s3029_s8 + $0x50] sm:$0xff]  ;;  %v3085_v27 = vld [vmem:[%s3029_s8 + $0x58] sm:$0x3]  ;;  %v356_v29 = vrot.slane %v3079_v25, 1  ;;  %v3093_v31 = vld [vmem:[%s3029_s8 + $0x60] sm:$0xff] }
  0x1d   : > { %2601 = vmatprep.mubr.msk.f32.mxu0 %vm455_vm2, %v348_v21  ;;  %2498 = vmatmul.mubr.msk.f32.vlgmr.msra.gmra.mrb[0].mxu1 %vm455_vm2, %v345_v22  ;;  %v350_v28 = vsel %vm340_vm1, %v347_v12, %v349_v17  ;;  %v357_v30 = vrot.slane %v3082_v26, 1  ;;  %v3096_v32 = vld [vmem:[%s3029_s8 + $0x68] sm:$0xff]  ;;  %v3106_v34 = vsel %vm340_vm1, %v351_v19, %v352_v23  ;;  %v359_v37 = vrot.slane %v3085_v27, 1  ;;  %v3133_v41 = vld [vmem:[%s3029_s8 + $0x70] sm:$0x3]  ;;  %v3157_v47 = vld [vmem:[%s3029_s8 + $0x78] sm:$0xff] }
  0x1e   : > { %2522 = vmatpush3.msk.msra.mxu1 %vm488_vm0, %v448_v0  ;;  %2602 = vmatmul.mubr.msk.f32.vlgmr.msra.gmra.mrb[0].mxu0 %vm455_vm2, %v350_v28  ;;  %v3122_v36 = vsel %vm340_vm1, %v352_v23, %v354_v24  ;;  %v361_v39 = vrot.slane %v3093_v31, 1  ;;  %v362_v40 = vrot.slane %v3096_v32, 1  ;;  %v364_v43 = vrot.slane %v3133_v41, 1  ;;  %v3160_v48 = vld [vmem:[%s3029_s8 + $0x80] sm:$0xff]  ;;  %v3169_v49 = vld [vmem:[%s3029_s8 + $0x88] sm:$0x3] }
  0x1f   : > { %2626 = vmatpush3.msk.msra.mxu0 %vm488_vm0, %v1347_v3  ;;  %2500 = vmatprep.mubr.msk.f32.mxu1 %vm455_vm2, %v348_v21  ;;  %v3128_v38 = vsel %vm340_vm1, %v356_v29, %v357_v30  ;;  %v3148_v42 = vsel %vm340_vm1, %v357_v30, %v359_v37  ;;  %v387_v45 = vrot.slane %v3039_v6, 2  ;;  %v388_v46 = vrot.slane %v3044_v9, 2  ;;  %v3184_v54 = vld [vmem:[%s3029_s8 + $0x90] sm:$0xff]  ;;  %v3187_v55 = vld [vmem:[%s3029_s8 + $0x98] sm:$0xff]  ;;  %v3214_v2 = vld [vmem:[%s3029_s8 + $0xa0] sm:$0x3] }
  0x20   : > { %2604 = vmatprep.mubr.msk.f32.mxu0 %vm455_vm2, %v3106_v34  ;;  %2651 = vmatprep.subr.msk.mxu0 %vm488_vm0, %v3101_v33  ;;  %v3152_v44 = vsel %vm340_vm1, %v361_v39, %v362_v40  ;;  %v390_v50 = vrot.slane %v3053_v14, 2  ;;  %v3179_v51 = vsel %vm340_vm1, %v362_v40, %v364_v43  ;;  %v366_v52 = vrot.slane %v3157_v47, 1  ;;  %v3223_v12 = vld [vmem:[%s3029_s8 + $0xa8] sm:$0xff]  ;;  %v3226_v13 = vld [vmem:[%s3029_s8 + $0xb0] sm:$0xff]  ;;  %v3239_v16 = vld [vmem:[%s3231_s27 + $0x20] sm:$0xff]  ;;  %p279_p8 = scmp.lt.s32.totalorder %s2181_s30, 31 }
  0x21   : > { %2501 = vmatmul.mubr.msk.f32.gmra.mrb[2].mxu1 %vm455_vm2, %v350_v28  ;;  %2547 = vmatprep.subr.msk.mxu1 %vm488_vm0, %v3111_v35  ;;  %v367_v53 = vrot.slane %v3160_v48, 1  ;;  %v3190_v56 = vsel %vm381_vm3, %v387_v45, %v388_v46  ;;  %v392_v57 = vrot.slane %v3056_v15, 2  ;;  %v393_v58 = vrot.slane %v3067_v18, 2  ;;  %v315_v17 = vld [vmem:[%s3231_s27 + $0x28] sm:$0x3]  ;;  %s2182_s5 = sshll.u32 %s3694_s16, 5 }
  0x22   : > { %2605 = vmatmul.mubr.msk.f32.gmra.mrb[2].mxu0 %vm455_vm2, %v3122_v36  ;;  %2503 = vmatprep.mubr.msk.f32.mxu1 %vm455_vm2, %v3106_v34  ;;  %v369_v59 = vrot.slane %v3169_v49, 1  ;;  %v395_v60 = vrot.slane %v3071_v20, 2  ;;  %v371_v61 = vrot.slane %v3184_v54, 1  ;;  %v372_v62 = vrot.slane %v3187_v55, 1  ;;  %v309_v29 = vld [vmem:[%s3029_s8 + $0xb8] sm:$0x3] }
  0x23   : > { %2607 = vmatprep.mubr.msk.f32.mxu0 %vm455_vm2, %v3128_v38  ;;  %v3208_v63 = vsel %vm381_vm3, %v388_v46, %v390_v50  ;;  %v3211_v0 = vsel %vm340_vm1, %v366_v52, %v367_v53  ;;  %v1683_v3 = vrot.slane %v3101_v33, 4  ;;  %v3218_v7 = vsel %vm381_vm3, %v392_v57, %v393_v58  ;;  %s3698_s30 = smov (!%p279_p8, %s2181_s30), 31 }
  0x24   : > { %v397_v8 = vrot.slane %v3079_v25, 2  ;;  %v398_v10 = vrot.slane %v3082_v26, 2  ;;  %v3236_v14 = vsel %vm340_vm1, %v367_v53, %v369_v59  ;;  %v3247_v19 = vsel %vm381_vm3, %v393_v58, %v395_v60  ;;  %s282_s6 = sadd.s32 %s2182_s5, %s3698_s30 }
  0x25   : > { %2504 = vmatmul.mubr.msk.f32.gmra.mrb[4].mxu1 %vm455_vm2, %v3122_v36  ;;  %v3250_v20 = vsel %vm340_vm1, %v371_v61, %v372_v62  ;;  %v374_v21 = vrot.slane %v3214_v2, 1  ;;  %v439_v22 = vrot.slane %v3239_v16, 1  ;;  %v400_v23 = vrot.slane %v3085_v27, 2  ;;  %s2183_s7 = sshll.u32 %s282_s6, 3 }
  0x26   : > { %2608 = vmatmul.mubr.msk.f32.gmra.mrb[4].mxu0 %vm455_vm2, %v3148_v42  ;;  %2506 = vmatprep.mubr.msk.f32.mxu1 %vm455_vm2, %v3128_v38  ;;  %v376_v24 = vrot.slane %v3223_v12, 1  ;;  %v377_v28 = vrot.slane %v3226_v13, 1  ;;  %v444_v30 = vrot.slane %v3239_v16, 2  ;;  %v3264_v37 = vsel %vm381_vm3, %v397_v8, %v398_v10  ;;  %s3628_s11 = scalar_lea.vmem %s3681_s4, %s2183_s7 }
  0x27   : > { %2610 = vmatprep.mubr.msk.f32.mxu0 %vm455_vm2, %v3152_v44  ;;  %v402_v39 = vrot.slane %v3093_v31, 2  ;;  %v403_v40 = vrot.slane %v3096_v32, 2  ;;  %v441_v43 = vrot.slane %v315_v17, 1  ;;  %v446_v27 = vrot.slane %v315_v17, 2 }
  0x28   : > { %v3278_v45 = vsel %vm340_vm1, %v372_v62, %v374_v21  ;;  %v379_v46 = vrot.slane %v309_v29, 1  ;;  %v3288_v52 = vsel %vm381_vm3, %v398_v10, %v400_v23  ;;  %v3291_v53 = vsel %vm340_vm1, %v376_v24, %v377_v28 }
  0x29   : > { %2507 = vmatmul.mubr.msk.f32.gmra.mrb[6].mxu1 %vm455_vm2, %v3148_v42  ;;  %v3283_v50 = vsel %vm340_vm1, %v439_v22, %v441_v43  ;;  %v405_v57 = vrot.slane %v3133_v41, 2  ;;  %v3297_v58 = vsel %vm381_vm3, %v444_v30, %v446_v27  ;;  %v3300_v59 = vsel %vm381_vm3, %v402_v39, %v403_v40  ;;  %v3345_v43 = vld [vmem:[%s3231_s27] sm:$0xff]  ;;  %v3348_v27 = vld [vmem:[%s3231_s27 + $0x8] sm:$0xff] }
  0x2a   : > { %2611 = vmatmul.mubr.msk.f32.gmra.mrb[6].mxu0 %vm455_vm2, %v3179_v51  ;;  %2509 = vmatprep.mubr.msk.f32.mxu1 %vm455_vm2, %v3152_v44  ;;  %v407_v60 = vrot.slane %v3157_v47, 2  ;;  %v408_v61 = vrot.slane %v3160_v48, 2  ;;  %v3311_v41 = vsel %vm340_vm1, %v377_v28, %v379_v46  ;;  %v410_v8 = vrot.slane %v3169_v49, 2 }
  0x2b   : > { %2627 = vmatprep.mubr.msk.f32.mxu0 %vm455_vm2, %v3190_v56  ;;  %v3316_v62 = vsel %vm381_vm3, %v403_v40, %v405_v57  ;;  %v412_v17 = vrot.slane %v3184_v54, 2  ;;  %v413_v21 = vrot.slane %v3187_v55, 2  ;;  %v415_v23 = vrot.slane %v3214_v2, 2 }
  0x2c   : > { %v3320_v10 = vsel %vm381_vm3, %v407_v60, %v408_v61  ;;  %v3333_v49 = vsel %vm381_vm3, %v408_v61, %v410_v8  ;;  %v1011_v24 = vrot.slane %v3111_v35, 4  ;;  %v417_v39 = vrot.slane %v3223_v12, 2  ;;  %v3367_v61 = vld [vmem:[%s3231_s27 + $0x10] sm:$0x3] }
  0x2d   : > { %2510 = vmatmul.mubr.msk.f32.gmra.mrb[8].mxu1 %vm455_vm2, %v3179_v51  ;;  %v3338_v28 = vsel %vm381_vm3, %v412_v17, %v413_v21  ;;  %v418_v40 = vrot.slane %v3226_v13, 2  ;;  %v3359_v2 = vsel %vm381_vm3, %v413_v21, %v415_v23  ;;  %v420_v46 = vrot.slane %v309_v29, 2  ;;  %v452_v23 = vld [vmem:[%s3679_s2 + $0x20] sm:$0xf] }
  0x2e   : > { %2628 = vmatmul.mubr.msk.f32.vlgmr.msra.gmra.mrb[0].mxu0 %vm455_vm2, %v3208_v63  ;;  %2512 = vmatprep.mubr.msk.f32.mxu1 %vm455_vm2, %v3211_v0  ;;  %v430_v60 = vrot.slane %v3345_v43, 2  ;;  %v433_v8 = vrot.slane %v3367_v61, 2 }
  0x2f   : > { %2652 = vmatpush3.msk.msra.mxu0 %vm488_vm0, %v3101_v33  ;;  %2630 = vmatprep.mubr.msk.f32.mxu0 %vm455_vm2, %v3218_v7  ;;  %v3362_v57 = vsel %vm381_vm3, %v417_v39, %v418_v40  ;;  %v3379_v29 = vsel %vm381_vm3, %v418_v40, %v420_v46  ;;  %v382_v33 = vrot.slane %v3033_v4, 2  ;;  %v385_v39 = vrot.slane %v3048_v11, 2 }
  0x30   : > { %2677 = vmatprep.subr.msk.mxu0 %vm488_vm0, %v1683_v3  ;;  %v425_v11 = vrot.slane %v3345_v43, 1 }
  0x31   : > { %2513 = vmatmul.mubr.msk.f32.gmra.mrb[10].mxu1 %vm455_vm2, %v3236_v14 }
  0x32   : > { %2631 = vmatmul.mubr.msk.f32.gmra.mrb[2].mxu0 %vm455_vm2, %v3247_v19  ;;  %2515 = vmatprep.mubr.msk.f32.mxu1 %vm455_vm2, %v3250_v20 }
  0x33   : > { %2633 = vmatprep.mubr.msk.f32.mxu0 %vm455_vm2, %v3264_v37 }
  0x35   : > { %2516 = vmatmul.mubr.msk.f32.gmra.mrb[12].mxu1 %vm455_vm2, %v3278_v45 }
  0x36   : > { %2634 = vmatmul.mubr.msk.f32.gmra.mrb[4].mxu0 %vm455_vm2, %v3288_v52  ;;  %2518 = vmatprep.mubr.msk.f32.mxu1 %vm455_vm2, %v3291_v53 }
  0x37   : > { %2636 = vmatprep.mubr.msk.f32.mxu0 %vm455_vm2, %v3300_v59 }
  0x39   : > { %2519 = vmatmul.mubr.msk.f32.gmra.mrb[14].mxu1 %vm455_vm2, %v3311_v41 }
  0x3a   : > { %2637 = vmatmul.mubr.msk.f32.gmra.mrb[6].mxu0 %vm455_vm2, %v3316_v62  ;;  %2523 = vmatprep.mubr.msk.f32.mxu1 %vm455_vm2, %v3033_v4 }
  0x3b   : > { %2639 = vmatprep.mubr.msk.f32.mxu0 %vm455_vm2, %v3320_v10 }
  0x3d   : > { %2524 = vmatmul.mubr.msk.f32.vlgmr.msra.gmra.mrb[0].mxu1 %vm455_vm2, %v3036_v5 }
  0x3e   : > { %2548 = vmatpush3.msk.msra.mxu1 %vm488_vm0, %v3111_v35  ;;  %2640 = vmatmul.mubr.msk.f32.gmra.mrb[8].mxu0 %vm455_vm2, %v3333_v49  ;;  %v431_v35 = vrot.slane %v3348_v27, 2 }
  0x3f   : > { %2526 = vmatprep.mubr.msk.f32.mxu1 %vm455_vm2, %v3039_v6  ;;  %2642 = vmatprep.mubr.msk.f32.mxu0 %vm455_vm2, %v3338_v28 }
  0x40   : > { %2573 = vmatprep.subr.msk.mxu1 %vm488_vm0, %v1011_v24  ;;  %v3383_v17 = vsel %vm381_vm3, %v430_v60, %v431_v35  ;;  %v3394_v21 = vsel %vm381_vm3, %v431_v35, %v433_v8 }
  0x41   : > { %2527 = vmatmul.mubr.msk.f32.gmra.mrb[2].mxu1 %vm455_vm2, %v3044_v9 }
  0x42   : > { %2643 = vmatmul.mubr.msk.f32.gmra.mrb[10].mxu0 %vm455_vm2, %v3359_v2  ;;  %2529 = vmatprep.mubr.msk.f32.mxu1 %vm455_vm2, %v3056_v15 }
  0x43   : > { %2645 = vmatprep.mubr.msk.f32.mxu0 %vm455_vm2, %v3362_v57 }
  0x45   : > { %2530 = vmatmul.mubr.msk.f32.gmra.mrb[4].mxu1 %vm455_vm2, %v3067_v18 }
  0x46   : > { %2646 = vmatmul.mubr.msk.f32.gmra.mrb[12].mxu0 %vm455_vm2, %v3379_v29  ;;  %2532 = vmatprep.mubr.msk.f32.mxu1 %vm455_vm2, %v3079_v25 }
  0x47   : > { %2648 = vmatprep.mubr.msk.f32.mxu0 %vm455_vm2, %v3383_v17 }
  0x49   : > { %2533 = vmatmul.mubr.msk.f32.gmra.mrb[6].mxu1 %vm455_vm2, %v3082_v26 }
  0x4a   : > { %2649 = vmatmul.mubr.msk.f32.gmra.mrb[14].mxu0 %vm455_vm2, %v3394_v21  ;;  %2535 = vmatprep.mubr.msk.f32.mxu1 %vm455_vm2, %v3093_v31 }
  0x4b   : > { %2653 = vmatprep.mubr.msk.f32.mxu0 %vm455_vm2, %v3056_v15 }
  0x4d   : > { %2536 = vmatmul.mubr.msk.f32.gmra.mrb[8].mxu1 %vm455_vm2, %v3096_v32 }
  0x4e   : > { %2654 = vmatmul.mubr.msk.f32.vlgmr.msra.gmra.mrb[0].mxu0 %vm455_vm2, %v3067_v18  ;;  %2538 = vmatprep.mubr.msk.f32.mxu1 %vm455_vm2, %v3157_v47 }
  0x4f   : > { %2678 = vmatpush3.msk.msra.mxu0 %vm488_vm0, %v1683_v3  ;;  %2656 = vmatprep.mubr.msk.f32.mxu0 %vm455_vm2, %v3079_v25  ;;  %v383_v3 = vrot.slane %v3036_v5, 2  ;;  %v3466_v5 = vld [vmem:[%s3231_s27 + $0x18] sm:$0xff] }
  0x50   : > { %2703 = vmatprep.subr.msk.mxu0 %vm488_vm0, %v452_v23 }
  0x51   : > { %2539 = vmatmul.mubr.msk.f32.gmra.mrb[10].mxu1 %vm455_vm2, %v3160_v48  ;;  %v384_v40 = vsel %vm381_vm3, %v382_v33, %v383_v3  ;;  %v386_v4 = vsel %vm381_vm3, %v383_v3, %v385_v39 }
  0x52   : > { %2657 = vmatmul.mubr.msk.f32.gmra.mrb[2].mxu0 %vm455_vm2, %v3082_v26  ;;  %2541 = vmatprep.mubr.msk.f32.mxu1 %vm455_vm2, %v3184_v54 }
  0x53   : > { %2659 = vmatprep.mubr.msk.f32.mxu0 %vm455_vm2, %v3093_v31 }
  0x55   : > { %2542 = vmatmul.mubr.msk.f32.gmra.mrb[12].mxu1 %vm455_vm2, %v3187_v55 }
  0x56   : > { %2660 = vmatmul.mubr.msk.f32.gmra.mrb[4].mxu0 %vm455_vm2, %v3096_v32  ;;  %2544 = vmatprep.mubr.msk.f32.mxu1 %vm455_vm2, %v3223_v12 }
  0x57   : > { %2662 = vmatprep.mubr.msk.f32.mxu0 %vm455_vm2, %v3157_v47 }
  0x59   : > { %2545 = vmatmul.mubr.msk.f32.gmra.mrb[14].mxu1 %vm455_vm2, %v3226_v13 }
  0x5a   : > { %2663 = vmatmul.mubr.msk.f32.gmra.mrb[6].mxu0 %vm455_vm2, %v3160_v48  ;;  %2549 = vmatprep.mubr.msk.f32.mxu1 %vm455_vm2, %v384_v40 }
  0x5b   : > { %2665 = vmatprep.mubr.msk.f32.mxu0 %vm455_vm2, %v3184_v54 }
  0x5d   : > { %2550 = vmatmul.mubr.msk.f32.vlgmr.msra.gmra.mrb[0].mxu1 %vm455_vm2, %v386_v4 }
  0x5e   : > { %2574 = vmatpush3.msk.msra.mxu1 %vm488_vm0, %v1011_v24  ;;  %2666 = vmatmul.mubr.msk.f32.gmra.mrb[8].mxu0 %vm455_vm2, %v3187_v55 }
  0x5f   : > { %2552 = vmatprep.mubr.msk.f32.mxu1 %vm455_vm2, %v3190_v56  ;;  %2668 = vmatprep.mubr.msk.f32.mxu0 %vm455_vm2, %v3223_v12 }
  0x60   : > { %2729 = vmatprep.subr.msk.mxu1 %vm488_vm0, %v3005_v1 }
  0x61   : > { %2553 = vmatmul.mubr.msk.f32.gmra.mrb[2].mxu1 %vm455_vm2, %v3208_v63 }
  0x62   : > { %2669 = vmatmul.mubr.msk.f32.gmra.mrb[10].mxu0 %vm455_vm2, %v3226_v13  ;;  %2555 = vmatprep.mubr.msk.f32.mxu1 %vm455_vm2, %v3218_v7 }
  0x63   : > { %2671 = vmatprep.mubr.msk.f32.mxu0 %vm455_vm2, %v3345_v43 }
  0x65   : > { %2556 = vmatmul.mubr.msk.f32.gmra.mrb[4].mxu1 %vm455_vm2, %v3247_v19 }
  0x66   : > { %2672 = vmatmul.mubr.msk.f32.gmra.mrb[12].mxu0 %vm455_vm2, %v3348_v27  ;;  %2558 = vmatprep.mubr.msk.f32.mxu1 %vm455_vm2, %v3264_v37 }
  0x67   : > { %2674 = vmatprep.mubr.msk.f32.mxu0 %vm455_vm2, %v3466_v5 }
  0x69   : > { %2559 = vmatmul.mubr.msk.f32.gmra.mrb[6].mxu1 %vm455_vm2, %v3288_v52 }
  0x6a   : > { %2675 = vmatmul.mubr.msk.f32.gmra.mrb[14].mxu0 %vm455_vm2, %v3239_v16  ;;  %2561 = vmatprep.mubr.msk.f32.mxu1 %vm455_vm2, %v3300_v59 }
  0x6b   : > { %2679 = vmatprep.mubr.msk.f32.mxu0 %vm455_vm2, %v3106_v34  ;;  %v426_v34 = vrot.slane %v3348_v27, 1 }
  0x6d   : > { %2562 = vmatmul.mubr.msk.f32.gmra.mrb[8].mxu1 %vm455_vm2, %v3316_v62 }
  0x6e   : > { %2680 = vmatmul.mubr.msk.f32.vlgmr.msra.gmra.mrb[0].mxu0 %vm455_vm2, %v3122_v36  ;;  %2564 = vmatprep.mubr.msk.f32.mxu1 %vm455_vm2, %v3320_v10  ;;  %v438_v36 = vrot.slane %v3466_v5, 1 }
  0x6f   : > { %2704 = vmatpush3.msk.msra.mxu0 %vm488_vm0, %v452_v23  ;;  %2682 = vmatprep.mubr.msk.f32.mxu0 %vm455_vm2, %v3128_v38  ;;  %v427_v38 = vsel %vm340_vm1, %v425_v11, %v426_v34 }
  0x71   : > { %2565 = vmatmul.mubr.msk.f32.gmra.mrb[10].mxu1 %vm455_vm2, %v3333_v49 }
  0x72   : > { %2683 = vmatmul.mubr.msk.f32.gmra.mrb[2].mxu0 %vm455_vm2, %v3148_v42  ;;  %2567 = vmatprep.mubr.msk.f32.mxu1 %vm455_vm2, %v3338_v28 }
  0x73   : > { %2685 = vmatprep.mubr.msk.f32.mxu0 %vm455_vm2, %v3152_v44 }
  0x75   : > { %2568 = vmatmul.mubr.msk.f32.gmra.mrb[12].mxu1 %vm455_vm2, %v3359_v2 }
  0x76   : > { %2686 = vmatmul.mubr.msk.f32.gmra.mrb[4].mxu0 %vm455_vm2, %v3179_v51  ;;  %2570 = vmatprep.mubr.msk.f32.mxu1 %vm455_vm2, %v3362_v57 }
  0x77   : > { %2688 = vmatprep.mubr.msk.f32.mxu0 %vm455_vm2, %v3211_v0 }
  0x79   : > { %2571 = vmatmul.mubr.msk.f32.gmra.mrb[14].mxu1 %vm455_vm2, %v3379_v29 }
  0x7a   : > { %2689 = vmatmul.mubr.msk.f32.gmra.mrb[6].mxu0 %vm455_vm2, %v3236_v14  ;;  %2575 = vmatprep.mubr.msk.f32.mxu1 %vm455_vm2, %v3039_v6  ;;  %v428_v6 = vrot.slane %v3367_v61, 1 }
  0x7b   : > { %2691 = vmatprep.mubr.msk.f32.mxu0 %vm455_vm2, %v3250_v20 }
  0x7d   : > { %2576 = vmatmul.mubr.msk.f32.vlgmr.msra.gmra.mrb[0].mxu1 %vm455_vm2, %v3044_v9  ;;  %v440_v9 = vsel %vm340_vm1, %v438_v36, %v439_v22 }
  0x7e   : > { %2730 = vmatpush3.msk.msra.mxu1 %vm488_vm0, %v3005_v1  ;;  %2692 = vmatmul.mubr.msk.f32.gmra.mrb[8].mxu0 %vm455_vm2, %v3278_v45  ;;  %v429_v1 = vsel %vm340_vm1, %v426_v34, %v428_v6 }
  0x7f   : > { %2578 = vmatprep.mubr.msk.f32.mxu1 %vm455_vm2, %v3056_v15  ;;  %2694 = vmatprep.mubr.msk.f32.mxu0 %vm455_vm2, %v3291_v53  ;;  %v443_v15 = vrot.slane %v3466_v5, 2 }
  0x81   : > { %2579 = vmatmul.mubr.msk.f32.gmra.mrb[2].mxu1 %vm455_vm2, %v3067_v18  ;;  %v445_v18 = vsel %vm381_vm3, %v443_v15, %v444_v30 }
  0x82   : > { %2695 = vmatmul.mubr.msk.f32.gmra.mrb[10].mxu0 %vm455_vm2, %v3311_v41  ;;  %2581 = vmatprep.mubr.msk.f32.mxu1 %vm455_vm2, %v3079_v25 }
  0x83   : > { %2697 = vmatprep.mubr.msk.f32.mxu0 %vm455_vm2, %v427_v38 }
  0x85   : > { %2582 = vmatmul.mubr.msk.f32.gmra.mrb[4].mxu1 %vm455_vm2, %v3082_v26 }
  0x86   : > { %2698 = vmatmul.mubr.msk.f32.gmra.mrb[12].mxu0 %vm455_vm2, %v429_v1  ;;  %2584 = vmatprep.mubr.msk.f32.mxu1 %vm455_vm2, %v3093_v31 }
  0x87   : > { %2700 = vmatprep.mubr.msk.f32.mxu0 %vm455_vm2, %v440_v9 }
  0x89   : > { %2585 = vmatmul.mubr.msk.f32.gmra.mrb[6].mxu1 %vm455_vm2, %v3096_v32 }
  0x8a   : > { %2701 = vmatmul.mubr.msk.f32.gmra.mrb[14].mxu0 %vm455_vm2, %v3283_v50  ;;  %2587 = vmatprep.mubr.msk.f32.mxu1 %vm455_vm2, %v3157_v47 }
  0x8b   : > { %2705 = vmatprep.mubr.msk.f32.mxu0 %vm455_vm2, %v3218_v7 }
  0x8d   : > { %2588 = vmatmul.mubr.msk.f32.gmra.mrb[8].mxu1 %vm455_vm2, %v3160_v48 }
  0x8e   : > { %2706 = vmatmul.mubr.msk.f32.vlgmr.msra.gmra.mrb[0].mxu0 %vm455_vm2, %v3247_v19  ;;  %2590 = vmatprep.mubr.msk.f32.mxu1 %vm455_vm2, %v3184_v54  ;;  %v3623_v54 = vld [vmem:[%s3680_s3] ss:$0 sm:$0xff] }
  0x8f   : > { %2708 = vmatprep.mubr.msk.f32.mxu0 %vm455_vm2, %v3264_v37 }
  0x91   : > { %2591 = vmatmul.mubr.msk.f32.gmra.mrb[10].mxu1 %vm455_vm2, %v3187_v55 }
  0x92   : > { %2709 = vmatmul.mubr.msk.f32.gmra.mrb[2].mxu0 %vm455_vm2, %v3288_v52  ;;  %2593 = vmatprep.mubr.msk.f32.mxu1 %vm455_vm2, %v3223_v12 }
  0x93   : > { %2711 = vmatprep.mubr.msk.f32.mxu0 %vm455_vm2, %v3300_v59 }
  0x95   : > { %2594 = vmatmul.mubr.msk.f32.gmra.mrb[12].mxu1 %vm455_vm2, %v3226_v13 }
  0x96   : > { %2712 = vmatmul.mubr.msk.f32.gmra.mrb[4].mxu0 %vm455_vm2, %v3316_v62  ;;  %2596 = vmatprep.mubr.msk.f32.mxu1 %vm455_vm2, %v3345_v43 }
  0x97   : > { %2714 = vmatprep.mubr.msk.f32.mxu0 %vm455_vm2, %v3320_v10 }
  0x99   : > { %2597 = vmatmul.mubr.msk.f32.gmra.mrb[14].mxu1 %vm455_vm2, %v3348_v27 }
  0x9a   : > { %2715 = vmatmul.mubr.msk.f32.gmra.mrb[6].mxu0 %vm455_vm2, %v3333_v49  ;;  %2613 = vmatprep.mubr.msk.f32.mxu1 %vm455_vm2, %v3211_v0 }
  0x9b   : > { %2717 = vmatprep.mubr.msk.f32.mxu0 %vm455_vm2, %v3338_v28 }
  0x9d   : > { %2614 = vmatmul.mubr.msk.f32.vlgmr.msra.gmra.mrb[8].mxu1 %vm455_vm2, %v3236_v14 }
  0x9e   : > { %2718 = vmatmul.mubr.msk.f32.gmra.mrb[8].mxu0 %vm455_vm2, %v3359_v2  ;;  %2616 = vmatprep.mubr.msk.f32.mxu1 %vm455_vm2, %v3250_v20 }
  0x9f   : > { %2720 = vmatprep.mubr.msk.f32.mxu0 %vm455_vm2, %v3362_v57 }
  0xa1   : > { %2617 = vmatmul.mubr.msk.f32.gmra.mrb[10].mxu1 %vm455_vm2, %v3278_v45 }
  0xa2   : > { %2721 = vmatmul.mubr.msk.f32.gmra.mrb[10].mxu0 %vm455_vm2, %v3379_v29  ;;  %2619 = vmatprep.mubr.msk.f32.mxu1 %vm455_vm2, %v3291_v53 }
  0xa3   : > { %2723 = vmatprep.mubr.msk.f32.mxu0 %vm455_vm2, %v3383_v17 }
  0xa5   : > { %2620 = vmatmul.mubr.msk.f32.gmra.mrb[12].mxu1 %vm455_vm2, %v3311_v41 }
  0xa6   : > { %2724 = vmatmul.mubr.msk.f32.gmra.mrb[12].mxu0 %vm455_vm2, %v3394_v21  ;;  %2622 = vmatprep.mubr.msk.f32.mxu1 %vm455_vm2, %v427_v38 }
  0xa7   : > { %2726 = vmatprep.mubr.msk.f32.mxu0 %vm455_vm2, %v445_v18 }
  0xa9   : > { %2623 = vmatmul.mubr.msk.f32.gmra.mrb[14].mxu1 %vm455_vm2, %v429_v1 }
  0xaa   : > { %2727 = vmatmul.mubr.msk.f32.gmra.mrb[14].mxu0 %vm455_vm2, %v3297_v58 }
 0x150   : > { %v2577_v25 = vpop.f32.mrb[0].mxu1 }
 0x151   : > { %v1084_v26 = vpop.f32.mrb[1].mxu1 }
 0x154   : > { %v2580_v31 = vpop.f32.mrb[2].mxu1 }
 0x155   : > { %v1094_v32 = vpop.f32.mrb[3].mxu1 }
 0x158   : > { %v2583_v42 = vpop.f32.mrb[4].mxu1 }
 0x159   : > { %v1104_v44 = vpop.f32.mrb[5].mxu1 }
 0x15c   : > { %v2586_v47 = vpop.f32.mrb[6].mxu1 }
 0x15d   : > { %v1114_v48 = vpop.f32.mrb[7].mxu1 }
 0x161   : > { %v2707_v51 = vpop.f32.mrb[0].mxu0 }
 0x162   : > { %v2731_v55 = vadd.f32 %v2707_v51, %v2577_v25  ;;  %v1924_v56 = vpop.f32.mrb[1].mxu0 }
 0x163   : > { %v2732_v63 = vadd.f32 %v1924_v56, %v1084_v26 }
 0x164   : > { %v2027_v0 = vadd.f32 %v2731_v55, %v3623_v54 }
 0x165   : > { %v2026_v7 = vadd.f32 %v2732_v63, %v3623_v54  ;;  %v2710_v12 = vpop.f32.mrb[2].mxu0 }
 0x166   : > { %2043 = vst [vmem:[%s3628_s11 + $0x8] sm:$0xff] %v2027_v0  ;;  %v2733_v13 = vadd.f32 %v2710_v12, %v2580_v31  ;;  %v1934_v14 = vpop.f32.mrb[3].mxu0 }
 0x167   : > { %2042 = vst [vmem:[%s3628_s11] sm:$0xff] %v2026_v7  ;;  %v2734_v16 = vadd.f32 %v1934_v14, %v1094_v32 }
 0x168   : > { %v2029_v19 = vadd.f32 %v2733_v13, %v3623_v54 }
 0x169   : > { %v2028_v20 = vadd.f32 %v2734_v16, %v3623_v54  ;;  %v2713_v22 = vpop.f32.mrb[4].mxu0 }
 0x16a   : > { %2045 = vst [vmem:[%s3628_s11 + $0x18] sm:$0xff] %v2029_v19  ;;  %v2735_v30 = vadd.f32 %v2713_v22, %v2583_v42  ;;  %v1944_v37 = vpop.f32.mrb[5].mxu0 }
 0x16b   : > { %2044 = vst [vmem:[%s3628_s11 + $0x10] sm:$0xff] %v2028_v20  ;;  %v2736_v45 = vadd.f32 %v1944_v37, %v1104_v44 }
 0x16c   : > { %v2031_v50 = vadd.f32 %v2735_v30, %v3623_v54 }
 0x16d   : > { %v2030_v52 = vadd.f32 %v2736_v45, %v3623_v54  ;;  %v2716_v53 = vpop.f32.mrb[6].mxu0 }
 0x16e   : > { %2047 = vst [vmem:[%s3628_s11 + $0x28] sm:$0xff] %v2031_v50  ;;  %v2737_v58 = vadd.f32 %v2716_v53, %v2586_v47  ;;  %v1954_v59 = vpop.f32.mrb[7].mxu0 }
 0x16f   : > { %2046 = vst [vmem:[%s3628_s11 + $0x20] sm:$0xff] %v2030_v52  ;;  %v2738_v41 = vadd.f32 %v1954_v59, %v1114_v48 }
 0x170   : > { %v2033_v62 = vadd.f32 %v2737_v58, %v3623_v54  ;;  %v2615_v10 = vpop.f32.mrb[8].mxu1 }
 0x171   : > { %v2032_v49 = vadd.f32 %v2738_v41, %v3623_v54  ;;  %v2719_v24 = vpop.f32.mrb[8].mxu0  ;;  %v1292_v28 = vpop.f32.mrb[9].mxu1 }
 0x172   : > { %2049 = vst [vmem:[%s3628_s11 + $0x38] sm:$0xff] %v2033_v62  ;;  %v2739_v43 = vadd.f32 %v2719_v24, %v2615_v10  ;;  %v1964_v27 = vpop.f32.mrb[9].mxu0 }
 0x173   : > { %2048 = vst [vmem:[%s3628_s11 + $0x30] sm:$0xff] %v2032_v49  ;;  %v2740_v2 = vadd.f32 %v1964_v27, %v1292_v28 }
 0x174   : > { %v2035_v46 = vadd.f32 %v2739_v43, %v3623_v54  ;;  %v2618_v57 = vpop.f32.mrb[10].mxu1 }
 0x175   : > { %v2034_v60 = vadd.f32 %v2740_v2, %v3623_v54  ;;  %v2722_v35 = vpop.f32.mrb[10].mxu0  ;;  %v1302_v61 = vpop.f32.mrb[11].mxu1 }
 0x176   : > { %2051 = vst [vmem:[%s3628_s11 + $0x48] sm:$0xff] %v2035_v46  ;;  %v2741_v29 = vadd.f32 %v2722_v35, %v2618_v57  ;;  %v1974_v8 = vpop.f32.mrb[11].mxu0 }
 0x177   : > { %2050 = vst [vmem:[%s3628_s11 + $0x40] sm:$0xff] %v2034_v60  ;;  %v2742_v17 = vadd.f32 %v1974_v8, %v1302_v61 }
 0x178   : > { %v2037_v21 = vadd.f32 %v2741_v29, %v3623_v54  ;;  %v2621_v23 = vpop.f32.mrb[12].mxu1 }
 0x179   : > { %v2036_v33 = vadd.f32 %v2742_v17, %v3623_v54  ;;  %v2725_v3 = vpop.f32.mrb[12].mxu0  ;;  %v1312_v39 = vpop.f32.mrb[13].mxu1 }
 0x17a   : > { %2053 = vst [vmem:[%s3628_s11 + $0x58] sm:$0xff] %v2037_v21  ;;  %v2743_v40 = vadd.f32 %v2725_v3, %v2621_v23  ;;  %v1984_v4 = vpop.f32.mrb[13].mxu0 }
 0x17b   : > { %2052 = vst [vmem:[%s3628_s11 + $0x50] sm:$0xff] %v2036_v33  ;;  %v2744_v5 = vadd.f32 %v1984_v4, %v1312_v39 }
 0x17c   : > { %v2039_v11 = vadd.f32 %v2743_v40, %v3623_v54  ;;  %v2624_v34 = vpop.f32.mrb[14].mxu1 }
 0x17d   : > { %v2038_v6 = vadd.f32 %v2744_v5, %v3623_v54  ;;  %v2728_v36 = vpop.f32.mrb[14].mxu0  ;;  %v1322_v38 = vpop.f32.mrb[15].mxu1 }
 0x17e   : > { %2055 = vst [vmem:[%s3628_s11 + $0x68] sm:$0xff] %v2039_v11  ;;  %v2745_v1 = vadd.f32 %v2728_v36, %v2624_v34  ;;  %v1994_v9 = vpop.f32.mrb[15].mxu0 }
 0x17f   : > { %2054 = vst [vmem:[%s3628_s11 + $0x60] sm:$0xff] %v2038_v6  ;;  %v2746_v15 = vadd.f32 %v1994_v9, %v1322_v38 }
 0x180   : > { %v2041_v18 = vadd.f32 %v2745_v1, %v3623_v54 }
 0x181   : > { %v2040_v25 = vadd.f32 %v2746_v15, %v3623_v54 }
 0x182   : > { %2057 = vst [vmem:[%s3628_s11 + $0x78] sm:$0xff] %v2041_v18 }
 0x183   : > { %2056 = vst [vmem:[%s3628_s11 + $0x70] sm:$0xff] %v2040_v25 }
 0x184 PF: > { %s14_s19 = sadd.s32 1, %s2940_s19   ;;  %s3683_s15 = smov %s2932_s17 }
 0x185   : > { %p11_p9 = scmp.ge.s32.totalorder %s14_s19, 6   ;;  %s3684_s16 = smov %s2936_s18 }
 0x186   : > { %s3685_s17 = smov %s3688_s20  ;;  %s3686_s18 = smov %s3692_s21 }
 0x187   :  { %13 = sbr.rel (!%p11_p9) target bundleno = 3 (0x3), region = 69 }

</bundles_post_ra>
